<compile_context>
chip_gen: v7x
topology: tpu7x:2x2x1
jax: 0.10.0
libtpu: 0.0.40
codegen_flags: <defaults>
</compile_context>

<pallas_src>
import functools

import jax
import jax.numpy as jnp
from jax.experimental import pallas as pl
from jax.experimental.pallas import tpu as pltpu

BN_EPS = 1e-5


def _round_up(x, m):
    return ((x + m - 1) // m) * m


# ---------------------------------------------------------------------------
# Kernel 1: tiled conv matmul  y = P @ W (+bias) (+relu), optionally emitting
# per-channel [sum, sumsq] accumulated across the M (row) grid axis for a
# following training-mode BatchNorm.  Grid = (n_blocks, m_blocks); the stats
# output block index depends only on n, so it stays resident (accumulator)
# across the whole "arbitrary" m sweep (init via pl.when at m == 0).
# ---------------------------------------------------------------------------
def _conv_mm_kernel(*refs, has_bias, emit_stats, relu):
    if has_bias:
        p_ref, w_ref, b_ref = refs[0], refs[1], refs[2]
        out_refs = refs[3:]
    else:
        p_ref, w_ref = refs[0], refs[1]
        b_ref = None
        out_refs = refs[2:]
    y_ref = out_refs[0]

    acc = jnp.dot(p_ref[...], w_ref[...], preferred_element_type=jnp.float32)
    if has_bias:
        acc = acc + b_ref[...]

    if emit_stats:
        stats_ref = out_refs[1]

        @pl.when(pl.program_id(1) == 0)
        def _init():
            stats_ref[...] = jnp.zeros_like(stats_ref)

        s1 = jnp.sum(acc, axis=0, keepdims=True)
        s2 = jnp.sum(acc * acc, axis=0, keepdims=True)
        stats_ref[...] += jnp.concatenate([s1, s2], axis=0)

    if relu:
        acc = jnp.maximum(acc, 0.0)
    y_ref[...] = acc


def conv_matmul(patches, w_mat, bias=None, *, emit_stats=False, relu=False,
                tm_default=256):
    """patches (M, K) x w_mat (K, N) -> (M, N) f32 [, stats (2, N)]."""
    M, K = patches.shape
    K2, N = w_mat.shape
    assert K == K2
    # Tile M (row) axis; zero-padded rows contribute 0 to sums and are sliced off.
    tm = min(tm_default, _round_up(M, 8))
    Mp = _round_up(M, tm)
    if Mp != M:
        patches = jnp.pad(patches, ((0, Mp - M), (0, 0)))
    tn = N if N <= 128 else 128
    assert N % tn == 0
    nm, nn = Mp // tm, N // tn

    args = [patches.astype(jnp.bfloat16), w_mat.astype(jnp.bfloat16)]
    in_specs = [pl.BlockSpec((tm, K), lambda n, m: (m, 0)),
                pl.BlockSpec((K, tn), lambda n, m: (0, n))]
    if bias is not None:
        args.append(bias.reshape(1, N).astype(jnp.float32))
        in_specs.append(pl.BlockSpec((1, tn), lambda n, m: (0, n)))

    if emit_stats:
        out_shape = (jax.ShapeDtypeStruct((Mp, N), jnp.float32),
                     jax.ShapeDtypeStruct((2, N), jnp.float32))
        out_specs = (pl.BlockSpec((tm, tn), lambda n, m: (m, n)),
                     pl.BlockSpec((2, tn), lambda n, m: (0, n)))
        semantics = ("parallel", "arbitrary")   # stats accumulate across m
    else:
        out_shape = jax.ShapeDtypeStruct((Mp, N), jnp.float32)
        out_specs = pl.BlockSpec((tm, tn), lambda n, m: (m, n))
        semantics = ("parallel", "parallel")

    kernel = functools.partial(_conv_mm_kernel, has_bias=bias is not None,
                               emit_stats=emit_stats, relu=relu)
    result = pl.pallas_call(
        kernel,
        grid=(nn, nm),
        in_specs=in_specs,
        out_shape=out_shape,
        out_specs=out_specs,
        compiler_params=pltpu.CompilerParams(dimension_semantics=semantics),
    )(*args)
    if emit_stats:
        y, stats = result
        return y[:M], stats
    return result[:M]


# ---------------------------------------------------------------------------
# Kernel 2: folded BN + ReLU epilogue, lane-dense layout (rows, Wo*Cout).
# One FMA pass: out = relu(y * scale + shift).
# ---------------------------------------------------------------------------
def _bn_apply_kernel(y_ref, scale_ref, shift_ref, o_ref, *, relu):
    v = y_ref[...] * scale_ref[...] + shift_ref[...]
    if relu:
        v = jnp.maximum(v, 0.0)
    o_ref[...] = v


def bn_apply(y2d, scale_row, shift_row, *, relu=True, tr_default=512):
    R, Wd = y2d.shape
    tr = min(tr_default, _round_up(R, 8))
    Rp = _round_up(R, tr)
    if Rp != R:
        y2d = jnp.pad(y2d, ((0, Rp - R), (0, 0)))
    nr = Rp // tr
    out = pl.pallas_call(
        functools.partial(_bn_apply_kernel, relu=relu),
        grid=(nr,),
        in_specs=[pl.BlockSpec((tr, Wd), lambda r: (r, 0)),
                  pl.BlockSpec((1, Wd), lambda r: (0, 0)),
                  pl.BlockSpec((1, Wd), lambda r: (0, 0))],
        out_shape=jax.ShapeDtypeStruct((Rp, Wd), jnp.float32),
        out_specs=pl.BlockSpec((tr, Wd), lambda r: (r, 0)),
        compiler_params=pltpu.CompilerParams(dimension_semantics=("parallel",)),
    )(y2d, scale_row, shift_row)
    return out[:R]


# ---------------------------------------------------------------------------
# Kernel 3: standalone per-channel sum / sumsq reduction over M (used where the
# stats cannot be fused into the matmul, i.e. after the transposed-conv
# parity interleave).  Resident (2, C) output accumulator, init at m == 0.
# ---------------------------------------------------------------------------
def _bn_stats_kernel(y_ref, stats_ref):
    @pl.when(pl.program_id(0) == 0)
    def _init():
        stats_ref[...] = jnp.zeros_like(stats_ref)

    y = y_ref[...]
    s1 = jnp.sum(y, axis=0, keepdims=True)
    s2 = jnp.sum(y * y, axis=0, keepdims=True)
    stats_ref[...] += jnp.concatenate([s1, s2], axis=0)


def bn_stats(y, *, tm_default=512):
    M, C = y.shape
    tm = min(tm_default, _round_up(M, 8))
    Mp = _round_up(M, tm)
    if Mp != M:
        y = jnp.pad(y, ((0, Mp - M), (0, 0)))
    nm = Mp // tm
    return pl.pallas_call(
        _bn_stats_kernel,
        grid=(nm,),
        in_specs=[pl.BlockSpec((tm, C), lambda m: (m, 0))],
        out_shape=jax.ShapeDtypeStruct((2, C), jnp.float32),
        out_specs=pl.BlockSpec((2, C), lambda m: (0, 0)),
        compiler_params=pltpu.CompilerParams(dimension_semantics=("arbitrary",)),
    )(y)


# ---------------------------------------------------------------------------
# Kernel 4: fused  latent = relu(xf @ W1 + b1) ; dec = relu(latent @ W2 + b2)
# Grid = (2 passes, F-blocks).  Pass 0 streams x / W1 blocks and accumulates
# the latent in its (resident, VMEM) output block (K reduction with pl.when
# init/finalize); pass 1 streams W2 / b2 blocks and writes dec blocks, reading
# the latent straight from VMEM (no HBM round-trip).
# ---------------------------------------------------------------------------
def _fc2_kernel(x_ref, w1_ref, b1_ref, w2_ref, b2_ref, lat_ref, dec_ref):
    p = pl.program_id(0)
    j = pl.program_id(1)
    nj = pl.num_programs(1)

    @pl.when(jnp.logical_and(p == 0, j == 0))
    def _init():
        lat_ref[...] = jnp.zeros_like(lat_ref)

    @pl.when(p == 0)
    def _accumulate():
        lat_ref[...] += jnp.dot(x_ref[...], w1_ref[...],
                                preferred_element_type=jnp.float32)

    @pl.when(jnp.logical_and(p == 0, j == nj - 1))
    def _finalize():
        lat_ref[...] = jnp.maximum(lat_ref[...] + b1_ref[...], 0.0)

    @pl.when(p == 1)
    def _decode():
        lat_b = lat_ref[...].astype(jnp.bfloat16)
        d = jnp.dot(lat_b, w2_ref[...], preferred_element_type=jnp.float32)
        dec_ref[...] = jnp.maximum(d + b2_ref[...], 0.0)


def fc_encoder_decoder(xf, w1, b1, w2, b2, *, tf_default=1024):
    B, F = xf.shape
    L = w1.shape[1]
    tf = min(tf_default, _round_up(F, 128))
    Fp = _round_up(F, tf)
    if Fp != F:
        xf = jnp.pad(xf, ((0, 0), (0, Fp - F)))
        w1 = jnp.pad(w1, ((0, Fp - F), (0, 0)))
        w2 = jnp.pad(w2, ((0, 0), (0, Fp - F)))
        b2 = jnp.pad(b2, (0, Fp - F))
    nf = Fp // tf

    lat, dec = pl.pallas_call(
        _fc2_kernel,
        grid=(2, nf),
        in_specs=[
            pl.BlockSpec((B, tf), lambda p, j: (0, j * (1 - p))),  # xf (pass 0)
            pl.BlockSpec((tf, L), lambda p, j: (j * (1 - p), 0)),  # W1 (pass 0)
            pl.BlockSpec((1, L), lambda p, j: (0, 0)),             # b1
            pl.BlockSpec((L, tf), lambda p, j: (0, j * p)),        # W2 (pass 1)
            pl.BlockSpec((1, tf), lambda p, j: (0, j * p)),        # b2 (pass 1)
        ],
        out_shape=(jax.ShapeDtypeStruct((B, L), jnp.float32),
                   jax.ShapeDtypeStruct((B, Fp), jnp.float32)),
        out_specs=(pl.BlockSpec((B, L), lambda p, j: (0, 0)),      # latent (resident)
                   pl.BlockSpec((B, tf), lambda p, j: (0, j * p))),
        compiler_params=pltpu.CompilerParams(
            dimension_semantics=("arbitrary", "arbitrary")),
    )(xf.astype(jnp.bfloat16), w1.astype(jnp.bfloat16),
      b1.reshape(1, L).astype(jnp.float32),
      w2.astype(jnp.bfloat16), b2.reshape(1, Fp).astype(jnp.float32))
    return lat, dec[:, :F]


# ---------------------------------------------------------------------------
# NHWC glue: im2col, folded BN params, conv / sub-pixel transposed conv.
# ---------------------------------------------------------------------------
def im2col_nhwc(x, k, stride):
    """(B,H,W,C) -> ((B*Ho*Wo, k*k*C), Ho, Wo); K ordered (kh, kw, c)."""
    B, H, W, C = x.shape
    Ho = (H - k) // stride + 1
    Wo = (W - k) // stride + 1
    cols = []
    for i in range(k):
        for j in range(k):
            cols.append(x[:, i:i + stride * Ho:stride, j:j + stride * Wo:stride, :])
    p = jnp.stack(cols, axis=3)                       # (B, Ho, Wo, k*k, C)
    return p.reshape(B * Ho * Wo, k * k * C), Ho, Wo


def fold_bn(stats, gamma, beta, count, eps=BN_EPS):
    mean = stats[0] / count
    var = stats[1] / count - mean * mean              # biased (training-mode) var
    scale = gamma * jax.lax.rsqrt(var + eps)
    shift = beta - mean * scale
    return scale, shift


def apply_bn_relu_nhwc(y_flat, stats, gamma, beta, B, Ho, Wo, C, eps=BN_EPS):
    scale, shift = fold_bn(stats, gamma, beta, B * Ho * Wo, eps)
    y2d = y_flat.reshape(B * Ho, Wo * C)              # lane-dense (rows, Wo*C)
    out = bn_apply(y2d, jnp.tile(scale, Wo)[None, :],
                   jnp.tile(shift, Wo)[None, :], relu=True)
    return out.reshape(B, Ho, Wo, C)


def conv2d_bn_relu(x, w_oihw, stride, gamma, beta, eps=BN_EPS):
    """Conv2d(bias=False) + BatchNorm2d (batch stats) + ReLU, NHWC in/out."""
    B, H, W, Cin = x.shape
    Cout, _, k, _ = w_oihw.shape
    patches, Ho, Wo = im2col_nhwc(x, k, stride)
    w_mat = jnp.transpose(w_oihw, (2, 3, 1, 0)).reshape(k * k * Cin, Cout)
    y, stats = conv_matmul(patches, w_mat, emit_stats=True, relu=False)
    return apply_bn_relu_nhwc(y, stats, gamma, beta, B, Ho, Wo, Cout, eps)


def _subpixel_weight(w_iohw):
    """ConvTranspose (Cin,Cout,3,3) -> (4*Cin, 4*Cout) 2x2-tap parity matrix."""
    Cin, Cout = w_iohw.shape[0], w_iohw.shape[1]
    g = lambda kh, kw: w_iohw[:, :, kh, kw]
    wq = jnp.zeros((2, 2, Cin, 4, Cout), w_iohw.dtype)
    # parity 0: even oh, even ow
    wq = wq.at[1, 1, :, 0, :].set(g(0, 0))
    wq = wq.at[0, 1, :, 0, :].set(g(2, 0))
    wq = wq.at[1, 0, :, 0, :].set(g(0, 2))
    wq = wq.at[0, 0, :, 0, :].set(g(2, 2))
    # parity 1: even oh, odd ow
    wq = wq.at[1, 1, :, 1, :].set(g(0, 1))
    wq = wq.at[0, 1, :, 1, :].set(g(2, 1))
    # parity 2: odd oh, even ow
    wq = wq.at[1, 1, :, 2, :].set(g(1, 0))
    wq = wq.at[1, 0, :, 2, :].set(g(1, 2))
    # parity 3: odd oh, odd ow
    wq = wq.at[1, 1, :, 3, :].set(g(1, 1))
    return wq.reshape(4 * Cin, 4 * Cout)


def conv_transpose2d_relu(x, w_iohw, bias=None, bn=None, eps=BN_EPS):
    """ConvTranspose2d(k=3, stride=2, padding=0) [+ BN] + ReLU, NHWC in/out."""
    B, H, W, Cin = x.shape
    Cout = w_iohw.shape[1]
    Ho, Wo = 2 * H + 1, 2 * W + 1
    xp = jnp.pad(x, ((0, 0), (1, 1), (1, 1), (0, 0)))
    patches, Hq, Wq = im2col_nhwc(xp, 2, 1)            # Hq = H+1, Wq = W+1
    w_big = _subpixel_weight(w_iohw)
    if bn is None:
        bias4 = jnp.tile(bias, 4) if bias is not None else None
        r = conv_matmul(patches, w_big, bias=bias4, relu=True)
    else:
        r = conv_matmul(patches, w_big, relu=False)    # BN stats need real pixels only
    r = r.reshape(B, Hq, Wq, 4, Cout)
    out = jnp.zeros((B, Ho, Wo, Cout), jnp.float32)
    out = out.at[:, 0::2, 0::2, :].set(r[:, :, :, 0, :])
    out = out.at[:, 0::2, 1::2, :].set(r[:, :, :W, 1, :])
    out = out.at[:, 1::2, 0::2, :].set(r[:, :H, :, 2, :])
    out = out.at[:, 1::2, 1::2, :].set(r[:, :H, :W, 3, :])
    if bn is not None:
        gamma, beta = bn
        stats = bn_stats(out.reshape(B * Ho * Wo, Cout))
        out = apply_bn_relu_nhwc(out.reshape(B * Ho * Wo, Cout), stats,
                                 gamma, beta, B, Ho, Wo, Cout, eps)
    return out


# ---------------------------------------------------------------------------
# Model: parameters + forward  (NCHW at the module boundary, NHWC inside)
# ---------------------------------------------------------------------------
def init_params(key, c, latent, s2):
    flat = 2 * c * s2 * s2
    ks = jax.random.split(key, 16)
    n = lambda i, shape, s: jax.random.normal(ks[i], shape, jnp.float32) * s
    p = {}
    # Encoder
    p["enc_conv1_w"] = n(0, (c, 3, 3, 3), 0.1)             # OIHW, bias=False
    p["enc_conv2_w"] = n(1, (2 * c, c, 3, 3), 0.1)         # OIHW, bias=False
    p["enc_bn1_g"] = 1.0 + n(2, (c,), 0.1)
    p["enc_bn1_b"] = n(3, (c,), 0.1)
    p["enc_bn2_g"] = 1.0 + n(4, (2 * c,), 0.1)
    p["enc_bn2_b"] = n(5, (2 * c,), 0.1)
    p["enc_fc_w"] = n(6, (flat, latent), 0.02)
    p["enc_fc_b"] = n(7, (latent,), 0.01)
    # Decoder
    p["dec_fc_w"] = n(8, (latent, flat), 0.02)
    p["dec_fc_b"] = n(9, (flat,), 0.01)
    p["dec_conv2_w"] = n(10, (2 * c, c, 3, 3), 0.1)        # IOHW (ConvTranspose), bias=False
    p["dec_bn2_g"] = 1.0 + n(11, (c,), 0.1)
    p["dec_bn2_b"] = n(12, (c,), 0.1)
    p["dec_conv1_w"] = n(13, (c, 3, 3, 3), 0.1)            # IOHW, Cout=3
    p["dec_conv1_b"] = n(14, (3,), 0.1)
    return p


def autoencoder_forward(params, x_nchw, c, s2):
    B = x_nchw.shape[0]
    x = jnp.transpose(x_nchw, (0, 2, 3, 1))                          # NHWC
    # ---- Encoder ----
    h = conv2d_bn_relu(x, params["enc_conv1_w"], 2,
                       params["enc_bn1_g"], params["enc_bn1_b"])     # (B, 9, 9, c)
    h = conv2d_bn_relu(h, params["enc_conv2_w"], 2,
                       params["enc_bn2_g"], params["enc_bn2_b"])     # (B, 4, 4, 2c)
    xf = jnp.transpose(h, (0, 3, 1, 2)).reshape(B, -1)               # torch.flatten(x,1) order
    # ---- Fused FC: latent = relu(fc(xf)); d = relu(fc(latent)) ----
    latent, dec = fc_encoder_decoder(xf, params["enc_fc_w"], params["enc_fc_b"],
                                     params["dec_fc_w"], params["dec_fc_b"])
    # ---- Decoder ----
    d = jnp.transpose(dec.reshape(B, 2 * c, s2, s2), (0, 2, 3, 1))   # Unflatten -> NHWC
    d = conv_transpose2d_relu(d, params["dec_conv2_w"],
                              bn=(params["dec_bn2_g"], params["dec_bn2_b"]))  # (B, 9, 9, c)
    d = conv_transpose2d_relu(d, params["dec_conv1_w"],
                              bias=params["dec_conv1_b"])            # (B, 19, 19, 3)
    return jnp.transpose(d, (0, 3, 1, 2)), latent                    # NCHW, latent


# ---------------------------------------------------------------------------
# Pure-jnp reference (zero-dilation conv-transpose, direct BN) for validation.
# ---------------------------------------------------------------------------
def _ref_mm(a, b):
    return jnp.dot(a.astype(jnp.bfloat16), b.astype(jnp.bfloat16),
                   preferred_element_type=jnp.float32)


def _ref_conv2d(x, w_oihw, stride):
    B, H, W, Cin = x.shape
    Cout, _, k, _ = w_oihw.shape
    patches, Ho, Wo = im2col_nhwc(x, k, stride)
    w_mat = jnp.transpose(w_oihw, (2, 3, 1, 0)).reshape(k * k * Cin, Cout)
    return _ref_mm(patches, w_mat).reshape(B, Ho, Wo, Cout)


def _ref_bn_relu(y, gamma, beta, eps=BN_EPS):
    mean = jnp.mean(y, axis=(0, 1, 2))
    var = jnp.mean((y - mean) ** 2, axis=(0, 1, 2))
    return jnp.maximum((y - mean) * jax.lax.rsqrt(var + eps) * gamma + beta, 0.0)


def _ref_conv_transpose2d(x, w_iohw, bias=None):
    B, H, W, Cin = x.shape
    k, s = 3, 2
    xd = jnp.zeros((B, (H - 1) * s + 1, (W - 1) * s + 1, Cin), x.dtype)
    xd = xd.at[:, ::s, ::s, :].set(x)
    xp = jnp.pad(xd, ((0, 0), (k - 1, k - 1), (k - 1, k - 1), (0, 0)))
    w_eq = jnp.transpose(jnp.flip(w_iohw, axis=(2, 3)), (1, 0, 2, 3))
    y = _ref_conv2d(xp, w_eq, 1)
    if bias is not None:
        y = y + bias
    return y


def ref_forward(params, x_nchw, c, s2):
    B = x_nchw.shape[0]
    x = jnp.transpose(x_nchw, (0, 2, 3, 1))
    h = _ref_bn_relu(_ref_conv2d(x, params["enc_conv1_w"], 2),
                     params["enc_bn1_g"], params["enc_bn1_b"])
    h = _ref_bn_relu(_ref_conv2d(h, params["enc_conv2_w"], 2),
                     params["enc_bn2_g"], params["enc_bn2_b"])
    xf = jnp.transpose(h, (0, 3, 1, 2)).reshape(B, -1)
    lat = jnp.maximum(_ref_mm(xf, params["enc_fc_w"]) + params["enc_fc_b"], 0.0)
    d = jnp.maximum(_ref_mm(lat, params["dec_fc_w"]) + params["dec_fc_b"], 0.0)
    d = jnp.transpose(d.reshape(B, 2 * c, s2, s2), (0, 2, 3, 1))
    d = _ref_bn_relu(_ref_conv_transpose2d(d, params["dec_conv2_w"]),
                     params["dec_bn2_g"], params["dec_bn2_b"])
    d = jnp.maximum(_ref_conv_transpose2d(d, params["dec_conv1_w"],
                                          params["dec_conv1_b"]), 0.0)
    return jnp.transpose(d, (0, 3, 1, 2)), lat


if __name__ == "__main__":
    C = 4        # num_channels (production: 64)
    LATENT = 32  # latent_dims
    B, S, S2 = 2, 19, 4          # 19 -> 9 -> 4 -> 9 -> 19

    key = jax.random.PRNGKey(0)
    k_param, k_x = jax.random.split(key)
    params = init_params(k_param, C, LATENT, S2)
    x = jax.random.normal(k_x, (B, 3, S, S), jnp.float32)

    fwd = jax.jit(functools.partial(autoencoder_forward, c=C, s2=S2))
    x_recon, latent = fwd(params, x)
    x_recon = jax.block_until_ready(x_recon)
    latent = jax.block_until_ready(latent)

    assert x_recon.shape == (B, 3, S, S), x_recon.shape
    assert latent.shape == (B, LATENT), latent.shape
    assert bool(jnp.all(jnp.isfinite(x_recon))) and bool(jnp.all(jnp.isfinite(latent)))

    # Validate the sub-pixel conv-transpose + two-pass BN against a pure-jnp
    # reference built with a structurally different (zero-dilation) formulation.
    xr_ref, lat_ref = ref_forward(params, x, C, S2)
    err_x = float(jnp.max(jnp.abs(x_recon - xr_ref)))
    err_l = float(jnp.max(jnp.abs(latent - lat_ref)))
    assert err_x < 3e-2 and err_l < 3e-2, (err_x, err_l)

    print("KERNEL_OK")
</pallas_src>

<mosaic_0001>
module attributes {stable_mosaic.version = 11 : i64} {
  func.func @_conv_mm_kernel(%arg0: i32, %arg1: i32, %arg2: memref<168x27xbf16, #tpu.memory_space<vmem>>, %arg3: memref<27x4xbf16, #tpu.memory_space<vmem>>, %arg4: memref<168x4xf32, #tpu.memory_space<vmem>>, %arg5: memref<2x4xf32, #tpu.memory_space<vmem>>) attributes {dimension_semantics = [#tpu.dimension_semantics<parallel>, #tpu.dimension_semantics<arbitrary>], iteration_bounds = array<i64: 1, 1>, scalar_prefetch = 0 : i64, scratch_operands = 0 : i64, tpu.core_type = #tpu.core_type<tc>, window_params = [{transform_indices = @transform_0, window_bounds = array<i64: 168, 27>}, {transform_indices = @transform_1, window_bounds = array<i64: 27, 4>}, {transform_indices = @transform_2, window_bounds = array<i64: 168, 4>}, {transform_indices = @transform_3, window_bounds = array<i64: 2, 4>}]} {
    %c0 = arith.constant 0 : index
    %c0_0 = arith.constant 0 : index
    %0 = vector.load %arg2[%c0, %c0_0] : memref<168x27xbf16, #tpu.memory_space<vmem>>, vector<168x27xbf16>
    %c0_1 = arith.constant 0 : index
    %c0_2 = arith.constant 0 : index
    %1 = vector.load %arg3[%c0_1, %c0_2] : memref<27x4xbf16, #tpu.memory_space<vmem>>, vector<27x4xbf16>
    %cst = arith.constant dense<0.000000e+00> : vector<168x4xf32>
    %2 = tpu.matmul %0, %1, %cst {dimension_numbers = #tpu.dot_dimension_numbers<[1], [0], [0], [1], [0, 0, 1, 1], [], []>} : vector<168x27xbf16>, vector<27x4xbf16>, vector<168x4xf32> -> vector<168x4xf32>
    %c0_i32 = arith.constant 0 : i32
    %3 = arith.cmpi eq, %arg1, %c0_i32 : i32
    %4 = arith.extui %3 : i1 to i32
    %c0_i32_3 = arith.constant 0 : i32
    %5 = arith.cmpi ne, %4, %c0_i32_3 : i32
    scf.if %5 {
      %cst_12 = arith.constant 0.000000e+00 : f32
      %16 = vector.broadcast %cst_12 : f32 to vector<2x4xf32>
      %c0_13 = arith.constant 0 : index
      %c0_14 = arith.constant 0 : index
      %17 = vector.load %arg5[%c0_13, %c0_14] : memref<2x4xf32, #tpu.memory_space<vmem>>, vector<2x4xf32>
      tpu.vector_store %arg5[%c0_13, %c0_14], %16 {strides = array<i32>} : memref<2x4xf32, #tpu.memory_space<vmem>>, vector<2x4xf32>,
    } else {
    }
    %cst_4 = arith.constant dense<0.000000e+00> : vector<4xf32>
    %6 = vector.multi_reduction <add>, %2, %cst_4 [0] : vector<168x4xf32> to vector<4xf32>
    %7 = vector.shape_cast %6 : vector<4xf32> to vector<1x4xf32>
    %8 = arith.mulf %2, %2 : vector<168x4xf32>
    %cst_5 = arith.constant dense<0.000000e+00> : vector<4xf32>
    %9 = vector.multi_reduction <add>, %8, %cst_5 [0] : vector<168x4xf32> to vector<4xf32>
    %10 = vector.shape_cast %9 : vector<4xf32> to vector<1x4xf32>
    %c0_6 = arith.constant 0 : index
    %c0_7 = arith.constant 0 : index
    %11 = vector.load %arg5[%c0_6, %c0_7] : memref<2x4xf32, #tpu.memory_space<vmem>>, vector<2x4xf32>
    %12 = tpu.concatenate %7, %10 in 0 : vector<1x4xf32>, vector<1x4xf32> -> vector<2x4xf32>
    %13 = arith.addf %11, %12 : vector<2x4xf32>
    %c0_8 = arith.constant 0 : index
    %c0_9 = arith.constant 0 : index
    %14 = vector.load %arg5[%c0_8, %c0_9] : memref<2x4xf32, #tpu.memory_space<vmem>>, vector<2x4xf32>
    tpu.vector_store %arg5[%c0_8, %c0_9], %13 {strides = array<i32>} : memref<2x4xf32, #tpu.memory_space<vmem>>, vector<2x4xf32>,
    %c0_10 = arith.constant 0 : index
    %c0_11 = arith.constant 0 : index
    %15 = vector.load %arg4[%c0_10, %c0_11] : memref<168x4xf32, #tpu.memory_space<vmem>>, vector<168x4xf32>
    tpu.vector_store %arg4[%c0_10, %c0_11], %2 {strides = array<i32>} : memref<168x4xf32, #tpu.memory_space<vmem>>, vector<168x4xf32>,
    return
  }
  func.func @transform_0(%arg0: i32, %arg1: i32) -> (i32, i32) {
    %c0_i32 = arith.constant 0 : i32
    %c0_i32_0 = arith.constant 0 : i32
    return %arg1, %c0_i32 : i32, i32
  }
  func.func @transform_1(%arg0: i32, %arg1: i32) -> (i32, i32) {
    %c0_i32 = arith.constant 0 : i32
    %c0_i32_0 = arith.constant 0 : i32
    return %c0_i32, %arg0 : i32, i32
  }
  func.func @transform_2(%arg0: i32, %arg1: i32) -> (i32, i32) {
    %c0_i32 = arith.constant 0 : i32
    return %arg1, %arg0 : i32, i32
  }
  func.func @transform_3(%arg0: i32, %arg1: i32) -> (i32, i32) {
    %c0_i32 = arith.constant 0 : i32
    %c0_i32_0 = arith.constant 0 : i32
    return %c0_i32, %arg0 : i32, i32
  }
}

module attributes {stable_mosaic.version = 11 : i64} {
  func.func @_bn_apply_kernel(%arg0: i32, %arg1: memref<24x36xf32, #tpu.memory_space<vmem>>, %arg2: memref<1x36xf32, #tpu.memory_space<vmem>>, %arg3: memref<1x36xf32, #tpu.memory_space<vmem>>, %arg4: memref<24x36xf32, #tpu.memory_space<vmem>>) attributes {dimension_semantics = [#tpu.dimension_semantics<parallel>], iteration_bounds = array<i64: 1>, scalar_prefetch = 0 : i64, scratch_operands = 0 : i64, tpu.core_type = #tpu.core_type<tc>, window_params = [{transform_indices = @transform_0, window_bounds = array<i64: 24, 36>}, {pipeline_mode = #tpu.pipeline_mode<synchronous>, transform_indices = @transform_1, window_bounds = array<i64: 1, 36>}, {pipeline_mode = #tpu.pipeline_mode<synchronous>, transform_indices = @transform_2, window_bounds = array<i64: 1, 36>}, {transform_indices = @transform_3, window_bounds = array<i64: 24, 36>}]} {
    %c0 = arith.constant 0 : index
    %c0_0 = arith.constant 0 : index
    %0 = vector.load %arg1[%c0, %c0_0] : memref<24x36xf32, #tpu.memory_space<vmem>>, vector<24x36xf32>
    %c0_1 = arith.constant 0 : index
    %c0_2 = arith.constant 0 : index
    %1 = vector.load %arg2[%c0_1, %c0_2] : memref<1x36xf32, #tpu.memory_space<vmem>>, vector<1x36xf32>
    %2 = vector.broadcast %1 : vector<1x36xf32> to vector<24x36xf32>
    %3 = arith.mulf %0, %2 : vector<24x36xf32>
    %c0_3 = arith.constant 0 : index
    %c0_4 = arith.constant 0 : index
    %4 = vector.load %arg3[%c0_3, %c0_4] : memref<1x36xf32, #tpu.memory_space<vmem>>, vector<1x36xf32>
    %5 = vector.broadcast %4 : vector<1x36xf32> to vector<24x36xf32>
    %6 = arith.addf %3, %5 : vector<24x36xf32>
    %cst = arith.constant 0.000000e+00 : f32
    %7 = vector.broadcast %cst : f32 to vector<24x36xf32>
    %8 = arith.maximumf %6, %7 : vector<24x36xf32>
    %c0_5 = arith.constant 0 : index
    %c0_6 = arith.constant 0 : index
    %9 = vector.load %arg4[%c0_5, %c0_6] : memref<24x36xf32, #tpu.memory_space<vmem>>, vector<24x36xf32>
    tpu.vector_store %arg4[%c0_5, %c0_6], %8 {strides = array<i32>} : memref<24x36xf32, #tpu.memory_space<vmem>>, vector<24x36xf32>,
    return
  }
  func.func @transform_0(%arg0: i32) -> (i32, i32) {
    %c0_i32 = arith.constant 0 : i32
    %c0_i32_0 = arith.constant 0 : i32
    return %arg0, %c0_i32 : i32, i32
  }
  func.func @transform_1(%arg0: i32) -> (i32, i32) {
    %c0_i32 = arith.constant 0 : i32
    %c0_i32_0 = arith.constant 0 : i32
    %c0_i32_1 = arith.constant 0 : i32
    return %c0_i32, %c0_i32_0 : i32, i32
  }
  func.func @transform_2(%arg0: i32) -> (i32, i32) {
    %c0_i32 = arith.constant 0 : i32
    %c0_i32_0 = arith.constant 0 : i32
    %c0_i32_1 = arith.constant 0 : i32
    return %c0_i32, %c0_i32_0 : i32, i32
  }
  func.func @transform_3(%arg0: i32) -> (i32, i32) {
    %c0_i32 = arith.constant 0 : i32
    %c0_i32_0 = arith.constant 0 : i32
    return %arg0, %c0_i32 : i32, i32
  }
}

module attributes {stable_mosaic.version = 11 : i64} {
  func.func @_conv_mm_kernel(%arg0: i32, %arg1: i32, %arg2: memref<32x36xbf16, #tpu.memory_space<vmem>>, %arg3: memref<36x8xbf16, #tpu.memory_space<vmem>>, %arg4: memref<32x8xf32, #tpu.memory_space<vmem>>, %arg5: memref<2x8xf32, #tpu.memory_space<vmem>>) attributes {dimension_semantics = [#tpu.dimension_semantics<parallel>, #tpu.dimension_semantics<arbitrary>], iteration_bounds = array<i64: 1, 1>, scalar_prefetch = 0 : i64, scratch_operands = 0 : i64, tpu.core_type = #tpu.core_type<tc>, window_params = [{transform_indices = @transform_0, window_bounds = array<i64: 32, 36>}, {transform_indices = @transform_1, window_bounds = array<i64: 36, 8>}, {transform_indices = @transform_2, window_bounds = array<i64: 32, 8>}, {transform_indices = @transform_3, window_bounds = array<i64: 2, 8>}]} {
    %c0 = arith.constant 0 : index
    %c0_0 = arith.constant 0 : index
    %0 = vector.load %arg2[%c0, %c0_0] : memref<32x36xbf16, #tpu.memory_space<vmem>>, vector<32x36xbf16>
    %c0_1 = arith.constant 0 : index
    %c0_2 = arith.constant 0 : index
    %1 = vector.load %arg3[%c0_1, %c0_2] : memref<36x8xbf16, #tpu.memory_space<vmem>>, vector<36x8xbf16>
    %cst = arith.constant dense<0.000000e+00> : vector<32x8xf32>
    %2 = tpu.matmul %0, %1, %cst {dimension_numbers = #tpu.dot_dimension_numbers<[1], [0], [0], [1], [0, 0, 1, 1], [], []>} : vector<32x36xbf16>, vector<36x8xbf16>, vector<32x8xf32> -> vector<32x8xf32>
    %c0_i32 = arith.constant 0 : i32
    %3 = arith.cmpi eq, %arg1, %c0_i32 : i32
    %4 = arith.extui %3 : i1 to i32
    %c0_i32_3 = arith.constant 0 : i32
    %5 = arith.cmpi ne, %4, %c0_i32_3 : i32
    scf.if %5 {
      %cst_12 = arith.constant 0.000000e+00 : f32
      %16 = vector.broadcast %cst_12 : f32 to vector<2x8xf32>
      %c0_13 = arith.constant 0 : index
      %c0_14 = arith.constant 0 : index
      %17 = vector.load %arg5[%c0_13, %c0_14] : memref<2x8xf32, #tpu.memory_space<vmem>>, vector<2x8xf32>
      tpu.vector_store %arg5[%c0_13, %c0_14], %16 {strides = array<i32>} : memref<2x8xf32, #tpu.memory_space<vmem>>, vector<2x8xf32>,
    } else {
    }
    %cst_4 = arith.constant dense<0.000000e+00> : vector<8xf32>
    %6 = vector.multi_reduction <add>, %2, %cst_4 [0] : vector<32x8xf32> to vector<8xf32>
    %7 = vector.shape_cast %6 : vector<8xf32> to vector<1x8xf32>
    %8 = arith.mulf %2, %2 : vector<32x8xf32>
    %cst_5 = arith.constant dense<0.000000e+00> : vector<8xf32>
    %9 = vector.multi_reduction <add>, %8, %cst_5 [0] : vector<32x8xf32> to vector<8xf32>
    %10 = vector.shape_cast %9 : vector<8xf32> to vector<1x8xf32>
    %c0_6 = arith.constant 0 : index
    %c0_7 = arith.constant 0 : index
    %11 = vector.load %arg5[%c0_6, %c0_7] : memref<2x8xf32, #tpu.memory_space<vmem>>, vector<2x8xf32>
    %12 = tpu.concatenate %7, %10 in 0 : vector<1x8xf32>, vector<1x8xf32> -> vector<2x8xf32>
    %13 = arith.addf %11, %12 : vector<2x8xf32>
    %c0_8 = arith.constant 0 : index
    %c0_9 = arith.constant 0 : index
    %14 = vector.load %arg5[%c0_8, %c0_9] : memref<2x8xf32, #tpu.memory_space<vmem>>, vector<2x8xf32>
    tpu.vector_store %arg5[%c0_8, %c0_9], %13 {strides = array<i32>} : memref<2x8xf32, #tpu.memory_space<vmem>>, vector<2x8xf32>,
    %c0_10 = arith.constant 0 : index
    %c0_11 = arith.constant 0 : index
    %15 = vector.load %arg4[%c0_10, %c0_11] : memref<32x8xf32, #tpu.memory_space<vmem>>, vector<32x8xf32>
    tpu.vector_store %arg4[%c0_10, %c0_11], %2 {strides = array<i32>} : memref<32x8xf32, #tpu.memory_space<vmem>>, vector<32x8xf32>,
    return
  }
  func.func @transform_0(%arg0: i32, %arg1: i32) -> (i32, i32) {
    %c0_i32 = arith.constant 0 : i32
    %c0_i32_0 = arith.constant 0 : i32
    return %arg1, %c0_i32 : i32, i32
  }
  func.func @transform_1(%arg0: i32, %arg1: i32) -> (i32, i32) {
    %c0_i32 = arith.constant 0 : i32
    %c0_i32_0 = arith.constant 0 : i32
    return %c0_i32, %arg0 : i32, i32
  }
  func.func @transform_2(%arg0: i32, %arg1: i32) -> (i32, i32) {
    %c0_i32 = arith.constant 0 : i32
    return %arg1, %arg0 : i32, i32
  }
  func.func @transform_3(%arg0: i32, %arg1: i32) -> (i32, i32) {
    %c0_i32 = arith.constant 0 : i32
    %c0_i32_0 = arith.constant 0 : i32
    return %c0_i32, %arg0 : i32, i32
  }
}

module attributes {stable_mosaic.version = 11 : i64} {
  func.func @_bn_apply_kernel(%arg0: i32, %arg1: memref<8x32xf32, #tpu.memory_space<vmem>>, %arg2: memref<1x32xf32, #tpu.memory_space<vmem>>, %arg3: memref<1x32xf32, #tpu.memory_space<vmem>>, %arg4: memref<8x32xf32, #tpu.memory_space<vmem>>) attributes {dimension_semantics = [#tpu.dimension_semantics<parallel>], iteration_bounds = array<i64: 1>, scalar_prefetch = 0 : i64, scratch_operands = 0 : i64, tpu.core_type = #tpu.core_type<tc>, window_params = [{transform_indices = @transform_0, window_bounds = array<i64: 8, 32>}, {pipeline_mode = #tpu.pipeline_mode<synchronous>, transform_indices = @transform_1, window_bounds = array<i64: 1, 32>}, {pipeline_mode = #tpu.pipeline_mode<synchronous>, transform_indices = @transform_2, window_bounds = array<i64: 1, 32>}, {transform_indices = @transform_3, window_bounds = array<i64: 8, 32>}]} {
    %c0 = arith.constant 0 : index
    %c0_0 = arith.constant 0 : index
    %0 = vector.load %arg1[%c0, %c0_0] : memref<8x32xf32, #tpu.memory_space<vmem>>, vector<8x32xf32>
    %c0_1 = arith.constant 0 : index
    %c0_2 = arith.constant 0 : index
    %1 = vector.load %arg2[%c0_1, %c0_2] : memref<1x32xf32, #tpu.memory_space<vmem>>, vector<1x32xf32>
    %2 = vector.broadcast %1 : vector<1x32xf32> to vector<8x32xf32>
    %3 = arith.mulf %0, %2 : vector<8x32xf32>
    %c0_3 = arith.constant 0 : index
    %c0_4 = arith.constant 0 : index
    %4 = vector.load %arg3[%c0_3, %c0_4] : memref<1x32xf32, #tpu.memory_space<vmem>>, vector<1x32xf32>
    %5 = vector.broadcast %4 : vector<1x32xf32> to vector<8x32xf32>
    %6 = arith.addf %3, %5 : vector<8x32xf32>
    %cst = arith.constant 0.000000e+00 : f32
    %7 = vector.broadcast %cst : f32 to vector<8x32xf32>
    %8 = arith.maximumf %6, %7 : vector<8x32xf32>
    %c0_5 = arith.constant 0 : index
    %c0_6 = arith.constant 0 : index
    %9 = vector.load %arg4[%c0_5, %c0_6] : memref<8x32xf32, #tpu.memory_space<vmem>>, vector<8x32xf32>
    tpu.vector_store %arg4[%c0_5, %c0_6], %8 {strides = array<i32>} : memref<8x32xf32, #tpu.memory_space<vmem>>, vector<8x32xf32>,
    return
  }
  func.func @transform_0(%arg0: i32) -> (i32, i32) {
    %c0_i32 = arith.constant 0 : i32
    %c0_i32_0 = arith.constant 0 : i32
    return %arg0, %c0_i32 : i32, i32
  }
  func.func @transform_1(%arg0: i32) -> (i32, i32) {
    %c0_i32 = arith.constant 0 : i32
    %c0_i32_0 = arith.constant 0 : i32
    %c0_i32_1 = arith.constant 0 : i32
    return %c0_i32, %c0_i32_0 : i32, i32
  }
  func.func @transform_2(%arg0: i32) -> (i32, i32) {
    %c0_i32 = arith.constant 0 : i32
    %c0_i32_0 = arith.constant 0 : i32
    %c0_i32_1 = arith.constant 0 : i32
    return %c0_i32, %c0_i32_0 : i32, i32
  }
  func.func @transform_3(%arg0: i32) -> (i32, i32) {
    %c0_i32 = arith.constant 0 : i32
    %c0_i32_0 = arith.constant 0 : i32
    return %arg0, %c0_i32 : i32, i32
  }
}

module attributes {stable_mosaic.version = 11 : i64} {
  func.func @_fc2_kernel(%arg0: i32, %arg1: i32, %arg2: memref<2x128xbf16, #tpu.memory_space<vmem>>, %arg3: memref<128x32xbf16, #tpu.memory_space<vmem>>, %arg4: memref<1x32xf32, #tpu.memory_space<vmem>>, %arg5: memref<32x128xbf16, #tpu.memory_space<vmem>>, %arg6: memref<1x128xf32, #tpu.memory_space<vmem>>, %arg7: memref<2x32xf32, #tpu.memory_space<vmem>>, %arg8: memref<2x128xf32, #tpu.memory_space<vmem>>) attributes {dimension_semantics = [#tpu.dimension_semantics<arbitrary>, #tpu.dimension_semantics<arbitrary>], iteration_bounds = array<i64: 2, 1>, scalar_prefetch = 0 : i64, scratch_operands = 0 : i64, tpu.core_type = #tpu.core_type<tc>, window_params = [{transform_indices = @transform_0, window_bounds = array<i64: 2, 128>}, {transform_indices = @transform_1, window_bounds = array<i64: 128, 32>}, {pipeline_mode = #tpu.pipeline_mode<synchronous>, transform_indices = @transform_2, window_bounds = array<i64: 1, 32>}, {transform_indices = @transform_3, window_bounds = array<i64: 32, 128>}, {transform_indices = @transform_4, window_bounds = array<i64: 1, 128>}, {pipeline_mode = #tpu.pipeline_mode<synchronous>, transform_indices = @transform_5, window_bounds = array<i64: 2, 32>}, {transform_indices = @transform_6, window_bounds = array<i64: 2, 128>}]} {
    %c0_i32 = arith.constant 0 : i32
    %0 = arith.cmpi eq, %arg0, %c0_i32 : i32
    %c0_i32_0 = arith.constant 0 : i32
    %1 = arith.cmpi eq, %arg1, %c0_i32_0 : i32
    %2 = arith.andi %0, %1 : i1
    %3 = arith.extui %2 : i1 to i32
    %c0_i32_1 = arith.constant 0 : i32
    %4 = arith.cmpi ne, %3, %c0_i32_1 : i32
    scf.if %4 {
      %cst = arith.constant 0.000000e+00 : f32
      %16 = vector.broadcast %cst : f32 to vector<2x32xf32>
      %c0 = arith.constant 0 : index
      %c0_8 = arith.constant 0 : index
      %17 = vector.load %arg7[%c0, %c0_8] : memref<2x32xf32, #tpu.memory_space<vmem>>, vector<2x32xf32>
      tpu.vector_store %arg7[%c0, %c0_8], %16 {strides = array<i32>} : memref<2x32xf32, #tpu.memory_space<vmem>>, vector<2x32xf32>,
    } else {
    }
    %c0_i32_2 = arith.constant 0 : i32
    %5 = arith.cmpi eq, %arg0, %c0_i32_2 : i32
    %6 = arith.extui %5 : i1 to i32
    %c0_i32_3 = arith.constant 0 : i32
    %7 = arith.cmpi ne, %6, %c0_i32_3 : i32
    scf.if %7 {
      %c0 = arith.constant 0 : index
      %c0_8 = arith.constant 0 : index
      %16 = vector.load %arg7[%c0, %c0_8] : memref<2x32xf32, #tpu.memory_space<vmem>>, vector<2x32xf32>
      %c0_9 = arith.constant 0 : index
      %c0_10 = arith.constant 0 : index
      %17 = vector.load %arg2[%c0_9, %c0_10] : memref<2x128xbf16, #tpu.memory_space<vmem>>, vector<2x128xbf16>
      %c0_11 = arith.constant 0 : index
      %c0_12 = arith.constant 0 : index
      %18 = vector.load %arg3[%c0_11, %c0_12] : memref<128x32xbf16, #tpu.memory_space<vmem>>, vector<128x32xbf16>
      %cst = arith.constant dense<0.000000e+00> : vector<2x32xf32>
      %19 = tpu.matmul %17, %18, %cst {dimension_numbers = #tpu.dot_dimension_numbers<[1], [0], [0], [1], [0, 0, 1, 1], [], []>} : vector<2x128xbf16>, vector<128x32xbf16>, vector<2x32xf32> -> vector<2x32xf32>
      %20 = arith.addf %16, %19 : vector<2x32xf32>
      %c0_13 = arith.constant 0 : index
      %c0_14 = arith.constant 0 : index
      %21 = vector.load %arg7[%c0_13, %c0_14] : memref<2x32xf32, #tpu.memory_space<vmem>>, vector<2x32xf32>
      tpu.vector_store %arg7[%c0_13, %c0_14], %20 {strides = array<i32>} : memref<2x32xf32, #tpu.memory_space<vmem>>, vector<2x32xf32>,
    } else {
    }
    %c0_i32_4 = arith.constant 0 : i32
    %8 = arith.cmpi eq, %arg0, %c0_i32_4 : i32
    %c0_i32_5 = arith.constant 0 : i32
    %9 = arith.cmpi eq, %arg1, %c0_i32_5 : i32
    %10 = arith.andi %8, %9 : i1
    %11 = arith.extui %10 : i1 to i32
    %c0_i32_6 = arith.constant 0 : i32
    %12 = arith.cmpi ne, %11, %c0_i32_6 : i32
    scf.if %12 {
      %c0 = arith.constant 0 : index
      %c0_8 = arith.constant 0 : index
      %16 = vector.load %arg7[%c0, %c0_8] : memref<2x32xf32, #tpu.memory_space<vmem>>, vector<2x32xf32>
      %c0_9 = arith.constant 0 : index
      %c0_10 = arith.constant 0 : index
      %17 = vector.load %arg4[%c0_9, %c0_10] : memref<1x32xf32, #tpu.memory_space<vmem>>, vector<1x32xf32>
      %18 = vector.broadcast %17 : vector<1x32xf32> to vector<2x32xf32>
      %19 = arith.addf %16, %18 : vector<2x32xf32>
      %cst = arith.constant 0.000000e+00 : f32
      %20 = vector.broadcast %cst : f32 to vector<2x32xf32>
      %21 = arith.maximumf %19, %20 : vector<2x32xf32>
      %c0_11 = arith.constant 0 : index
      %c0_12 = arith.constant 0 : index
      %22 = vector.load %arg7[%c0_11, %c0_12] : memref<2x32xf32, #tpu.memory_space<vmem>>, vector<2x32xf32>
      tpu.vector_store %arg7[%c0_11, %c0_12], %21 {strides = array<i32>} : memref<2x32xf32, #tpu.memory_space<vmem>>, vector<2x32xf32>,
    } else {
    }
    %c1_i32 = arith.constant 1 : i32
    %13 = arith.cmpi eq, %arg0, %c1_i32 : i32
    %14 = arith.extui %13 : i1 to i32
    %c0_i32_7 = arith.constant 0 : i32
    %15 = arith.cmpi ne, %14, %c0_i32_7 : i32
    scf.if %15 {
      %c0 = arith.constant 0 : index
      %c0_8 = arith.constant 0 : index
      %16 = vector.load %arg7[%c0, %c0_8] : memref<2x32xf32, #tpu.memory_space<vmem>>, vector<2x32xf32>
      %17 = arith.truncf %16 : vector<2x32xf32> to vector<2x32xbf16>
      %c0_9 = arith.constant 0 : index
      %c0_10 = arith.constant 0 : index
      %18 = vector.load %arg5[%c0_9, %c0_10] : memref<32x128xbf16, #tpu.memory_space<vmem>>, vector<32x128xbf16>
      %cst = arith.constant dense<0.000000e+00> : vector<2x128xf32>
      %19 = tpu.matmul %17, %18, %cst {dimension_numbers = #tpu.dot_dimension_numbers<[1], [0], [0], [1], [0, 0, 1, 1], [], []>} : vector<2x32xbf16>, vector<32x128xbf16>, vector<2x128xf32> -> vector<2x128xf32>
      %c0_11 = arith.constant 0 : index
      %c0_12 = arith.constant 0 : index
      %20 = vector.load %arg6[%c0_11, %c0_12] : memref<1x128xf32, #tpu.memory_space<vmem>>, vector<1x128xf32>
      %21 = vector.broadcast %20 : vector<1x128xf32> to vector<2x128xf32>
      %22 = arith.addf %19, %21 : vector<2x128xf32>
      %cst_13 = arith.constant 0.000000e+00 : f32
      %23 = vector.broadcast %cst_13 : f32 to vector<2x128xf32>
      %24 = arith.maximumf %22, %23 : vector<2x128xf32>
      %c0_14 = arith.constant 0 : index
      %c0_15 = arith.constant 0 : index
      %25 = vector.load %arg8[%c0_14, %c0_15] : memref<2x128xf32, #tpu.memory_space<vmem>>, vector<2x128xf32>
      tpu.vector_store %arg8[%c0_14, %c0_15], %24 {strides = array<i32>} : memref<2x128xf32, #tpu.memory_space<vmem>>, vector<2x128xf32>,
    } else {
    }
    return
  }
  func.func @transform_0(%arg0: i32, %arg1: i32) -> (i32, i32) {
    %c1_i32 = arith.constant 1 : i32
    %0 = arith.subi %c1_i32, %arg0 : i32
    %1 = arith.muli %arg1, %0 : i32
    %c0_i32 = arith.constant 0 : i32
    %c0_i32_0 = arith.constant 0 : i32
    return %c0_i32, %1 : i32, i32
  }
  func.func @transform_1(%arg0: i32, %arg1: i32) -> (i32, i32) {
    %c1_i32 = arith.constant 1 : i32
    %0 = arith.subi %c1_i32, %arg0 : i32
    %1 = arith.muli %arg1, %0 : i32
    %c0_i32 = arith.constant 0 : i32
    %c0_i32_0 = arith.constant 0 : i32
    return %1, %c0_i32 : i32, i32
  }
  func.func @transform_2(%arg0: i32, %arg1: i32) -> (i32, i32) {
    %c0_i32 = arith.constant 0 : i32
    %c0_i32_0 = arith.constant 0 : i32
    %c0_i32_1 = arith.constant 0 : i32
    return %c0_i32, %c0_i32_0 : i32, i32
  }
  func.func @transform_3(%arg0: i32, %arg1: i32) -> (i32, i32) {
    %0 = arith.muli %arg1, %arg0 : i32
    %c0_i32 = arith.constant 0 : i32
    %c0_i32_0 = arith.constant 0 : i32
    return %c0_i32, %0 : i32, i32
  }
  func.func @transform_4(%arg0: i32, %arg1: i32) -> (i32, i32) {
    %0 = arith.muli %arg1, %arg0 : i32
    %c0_i32 = arith.constant 0 : i32
    %c0_i32_0 = arith.constant 0 : i32
    return %c0_i32, %0 : i32, i32
  }
  func.func @transform_5(%arg0: i32, %arg1: i32) -> (i32, i32) {
    %c0_i32 = arith.constant 0 : i32
    %c0_i32_0 = arith.constant 0 : i32
    %c0_i32_1 = arith.constant 0 : i32
    return %c0_i32, %c0_i32_0 : i32, i32
  }
  func.func @transform_6(%arg0: i32, %arg1: i32) -> (i32, i32) {
    %0 = arith.muli %arg1, %arg0 : i32
    %c0_i32 = arith.constant 0 : i32
    %c0_i32_0 = arith.constant 0 : i32
    return %c0_i32, %0 : i32, i32
  }
}

module attributes {stable_mosaic.version = 11 : i64} {
  func.func @_conv_mm_kernel(%arg0: i32, %arg1: i32, %arg2: memref<56x32xbf16, #tpu.memory_space<vmem>>, %arg3: memref<32x16xbf16, #tpu.memory_space<vmem>>, %arg4: memref<56x16xf32, #tpu.memory_space<vmem>>) attributes {dimension_semantics = [#tpu.dimension_semantics<parallel>, #tpu.dimension_semantics<parallel>], iteration_bounds = array<i64: 1, 1>, scalar_prefetch = 0 : i64, scratch_operands = 0 : i64, tpu.core_type = #tpu.core_type<tc>, window_params = [{transform_indices = @transform_0, window_bounds = array<i64: 56, 32>}, {transform_indices = @transform_1, window_bounds = array<i64: 32, 16>}, {transform_indices = @transform_2, window_bounds = array<i64: 56, 16>}]} {
    %c0 = arith.constant 0 : index
    %c0_0 = arith.constant 0 : index
    %0 = vector.load %arg2[%c0, %c0_0] : memref<56x32xbf16, #tpu.memory_space<vmem>>, vector<56x32xbf16>
    %c0_1 = arith.constant 0 : index
    %c0_2 = arith.constant 0 : index
    %1 = vector.load %arg3[%c0_1, %c0_2] : memref<32x16xbf16, #tpu.memory_space<vmem>>, vector<32x16xbf16>
    %cst = arith.constant dense<0.000000e+00> : vector<56x16xf32>
    %2 = tpu.matmul %0, %1, %cst {dimension_numbers = #tpu.dot_dimension_numbers<[1], [0], [0], [1], [0, 0, 1, 1], [], []>} : vector<56x32xbf16>, vector<32x16xbf16>, vector<56x16xf32> -> vector<56x16xf32>
    %c0_3 = arith.constant 0 : index
    %c0_4 = arith.constant 0 : index
    %3 = vector.load %arg4[%c0_3, %c0_4] : memref<56x16xf32, #tpu.memory_space<vmem>>, vector<56x16xf32>
    tpu.vector_store %arg4[%c0_3, %c0_4], %2 {strides = array<i32>} : memref<56x16xf32, #tpu.memory_space<vmem>>, vector<56x16xf32>,
    return
  }
  func.func @transform_0(%arg0: i32, %arg1: i32) -> (i32, i32) {
    %c0_i32 = arith.constant 0 : i32
    %c0_i32_0 = arith.constant 0 : i32
    return %arg1, %c0_i32 : i32, i32
  }
  func.func @transform_1(%arg0: i32, %arg1: i32) -> (i32, i32) {
    %c0_i32 = arith.constant 0 : i32
    %c0_i32_0 = arith.constant 0 : i32
    return %c0_i32, %arg0 : i32, i32
  }
  func.func @transform_2(%arg0: i32, %arg1: i32) -> (i32, i32) {
    %c0_i32 = arith.constant 0 : i32
    return %arg1, %arg0 : i32, i32
  }
}

module attributes {stable_mosaic.version = 11 : i64} {
  func.func @_bn_stats_kernel(%arg0: i32, %arg1: memref<168x4xf32, #tpu.memory_space<vmem>>, %arg2: memref<2x4xf32, #tpu.memory_space<vmem>>) attributes {dimension_semantics = [#tpu.dimension_semantics<arbitrary>], iteration_bounds = array<i64: 1>, scalar_prefetch = 0 : i64, scratch_operands = 0 : i64, tpu.core_type = #tpu.core_type<tc>, window_params = [{transform_indices = @transform_0, window_bounds = array<i64: 168, 4>}, {pipeline_mode = #tpu.pipeline_mode<synchronous>, transform_indices = @transform_1, window_bounds = array<i64: 2, 4>}]} {
    %c0_i32 = arith.constant 0 : i32
    %0 = arith.cmpi eq, %arg0, %c0_i32 : i32
    %1 = arith.extui %0 : i1 to i32
    %c0_i32_0 = arith.constant 0 : i32
    %2 = arith.cmpi ne, %1, %c0_i32_0 : i32
    scf.if %2 {
      %cst_7 = arith.constant 0.000000e+00 : f32
      %13 = vector.broadcast %cst_7 : f32 to vector<2x4xf32>
      %c0_8 = arith.constant 0 : index
      %c0_9 = arith.constant 0 : index
      %14 = vector.load %arg2[%c0_8, %c0_9] : memref<2x4xf32, #tpu.memory_space<vmem>>, vector<2x4xf32>
      tpu.vector_store %arg2[%c0_8, %c0_9], %13 {strides = array<i32>} : memref<2x4xf32, #tpu.memory_space<vmem>>, vector<2x4xf32>,
    } else {
    }
    %c0 = arith.constant 0 : index
    %c0_1 = arith.constant 0 : index
    %3 = vector.load %arg1[%c0, %c0_1] : memref<168x4xf32, #tpu.memory_space<vmem>>, vector<168x4xf32>
    %cst = arith.constant dense<0.000000e+00> : vector<4xf32>
    %4 = vector.multi_reduction <add>, %3, %cst [0] : vector<168x4xf32> to vector<4xf32>
    %5 = vector.shape_cast %4 : vector<4xf32> to vector<1x4xf32>
    %6 = arith.mulf %3, %3 : vector<168x4xf32>
    %cst_2 = arith.constant dense<0.000000e+00> : vector<4xf32>
    %7 = vector.multi_reduction <add>, %6, %cst_2 [0] : vector<168x4xf32> to vector<4xf32>
    %8 = vector.shape_cast %7 : vector<4xf32> to vector<1x4xf32>
    %c0_3 = arith.constant 0 : index
    %c0_4 = arith.constant 0 : index
    %9 = vector.load %arg2[%c0_3, %c0_4] : memref<2x4xf32, #tpu.memory_space<vmem>>, vector<2x4xf32>
    %10 = tpu.concatenate %5, %8 in 0 : vector<1x4xf32>, vector<1x4xf32> -> vector<2x4xf32>
    %11 = arith.addf %9, %10 : vector<2x4xf32>
    %c0_5 = arith.constant 0 : index
    %c0_6 = arith.constant 0 : index
    %12 = vector.load %arg2[%c0_5, %c0_6] : memref<2x4xf32, #tpu.memory_space<vmem>>, vector<2x4xf32>
    tpu.vector_store %arg2[%c0_5, %c0_6], %11 {strides = array<i32>} : memref<2x4xf32, #tpu.memory_space<vmem>>, vector<2x4xf32>,
    return
  }
  func.func @transform_0(%arg0: i32) -> (i32, i32) {
    %c0_i32 = arith.constant 0 : i32
    %c0_i32_0 = arith.constant 0 : i32
    return %arg0, %c0_i32 : i32, i32
  }
  func.func @transform_1(%arg0: i32) -> (i32, i32) {
    %c0_i32 = arith.constant 0 : i32
    %c0_i32_0 = arith.constant 0 : i32
    %c0_i32_1 = arith.constant 0 : i32
    return %c0_i32, %c0_i32_0 : i32, i32
  }
}

module attributes {stable_mosaic.version = 11 : i64} {
  func.func @_conv_mm_kernel(%arg0: i32, %arg1: i32, %arg2: memref<200x16xbf16, #tpu.memory_space<vmem>>, %arg3: memref<16x12xbf16, #tpu.memory_space<vmem>>, %arg4: memref<1x12xf32, #tpu.memory_space<vmem>>, %arg5: memref<200x12xf32, #tpu.memory_space<vmem>>) attributes {dimension_semantics = [#tpu.dimension_semantics<parallel>, #tpu.dimension_semantics<parallel>], iteration_bounds = array<i64: 1, 1>, scalar_prefetch = 0 : i64, scratch_operands = 0 : i64, tpu.core_type = #tpu.core_type<tc>, window_params = [{transform_indices = @transform_0, window_bounds = array<i64: 200, 16>}, {transform_indices = @transform_1, window_bounds = array<i64: 16, 12>}, {transform_indices = @transform_2, window_bounds = array<i64: 1, 12>}, {transform_indices = @transform_3, window_bounds = array<i64: 200, 12>}]} {
    %c0 = arith.constant 0 : index
    %c0_0 = arith.constant 0 : index
    %0 = vector.load %arg2[%c0, %c0_0] : memref<200x16xbf16, #tpu.memory_space<vmem>>, vector<200x16xbf16>
    %c0_1 = arith.constant 0 : index
    %c0_2 = arith.constant 0 : index
    %1 = vector.load %arg3[%c0_1, %c0_2] : memref<16x12xbf16, #tpu.memory_space<vmem>>, vector<16x12xbf16>
    %cst = arith.constant dense<0.000000e+00> : vector<200x12xf32>
    %2 = tpu.matmul %0, %1, %cst {dimension_numbers = #tpu.dot_dimension_numbers<[1], [0], [0], [1], [0, 0, 1, 1], [], []>} : vector<200x16xbf16>, vector<16x12xbf16>, vector<200x12xf32> -> vector<200x12xf32>
    %c0_3 = arith.constant 0 : index
    %c0_4 = arith.constant 0 : index
    %3 = vector.load %arg4[%c0_3, %c0_4] : memref<1x12xf32, #tpu.memory_space<vmem>>, vector<1x12xf32>
    %4 = vector.broadcast %3 : vector<1x12xf32> to vector<200x12xf32>
    %5 = arith.addf %2, %4 : vector<200x12xf32>
    %cst_5 = arith.constant 0.000000e+00 : f32
    %6 = vector.broadcast %cst_5 : f32 to vector<200x12xf32>
    %7 = arith.maximumf %5, %6 : vector<200x12xf32>
    %c0_6 = arith.constant 0 : index
    %c0_7 = arith.constant 0 : index
    %8 = vector.load %arg5[%c0_6, %c0_7] : memref<200x12xf32, #tpu.memory_space<vmem>>, vector<200x12xf32>
    tpu.vector_store %arg5[%c0_6, %c0_7], %7 {strides = array<i32>} : memref<200x12xf32, #tpu.memory_space<vmem>>, vector<200x12xf32>,
    return
  }
  func.func @transform_0(%arg0: i32, %arg1: i32) -> (i32, i32) {
    %c0_i32 = arith.constant 0 : i32
    %c0_i32_0 = arith.constant 0 : i32
    return %arg1, %c0_i32 : i32, i32
  }
  func.func @transform_1(%arg0: i32, %arg1: i32) -> (i32, i32) {
    %c0_i32 = arith.constant 0 : i32
    %c0_i32_0 = arith.constant 0 : i32
    return %c0_i32, %arg0 : i32, i32
  }
  func.func @transform_2(%arg0: i32, %arg1: i32) -> (i32, i32) {
    %c0_i32 = arith.constant 0 : i32
    %c0_i32_0 = arith.constant 0 : i32
    return %c0_i32, %arg0 : i32, i32
  }
  func.func @transform_3(%arg0: i32, %arg1: i32) -> (i32, i32) {
    %c0_i32 = arith.constant 0 : i32
    return %arg1, %arg0 : i32, i32
  }
}

</mosaic_0001>

<bundles_post_ra>
// kernel: tile.38
= control target key start
LH: loop header
LB: loop body
LE: loop exit
PB: predicated region body
PF: predicated region fallthrough
CT: control target
= control target key end

     0   :  { %s28_s0 = inlined_call_operand.vmem [shape: f32[4], index: 0, kind: input, shape index: {}]   ;;  %s29_s1 = inlined_call_operand.vmem [shape: f32[9,4], index: 1, kind: output, shape index: {}]  }
   0x1   :  { %v4_v0 = vld [vmem:[%s28_s0] ss:$0 sm:$0xff] }
   0x2   :  { %5 = vst [vmem:[%s29_s1] sm:$0xff] %v4_v0  ;;  %8 = vst [vmem:[%s29_s1 + $0x8] sm:$0xff] %v4_v0 }

// kernel: tile.39
= control target key start
LH: loop header
LB: loop body
LE: loop exit
PB: predicated region body
PF: predicated region fallthrough
CT: control target
= control target key end

     0   :  { %s75_s10 = smov 32   ;;  %s76_s11 = smov 24   ;;  %vm3_vm0 = vcmask 31744   ;;  %vm9_vm1 = vcmask 294144   ;;  %vm15_vm2 = vcmask 261344   ;;  %vm21_vm3 = vcmask 228544   ;;  %s123_s0 = inlined_call_operand.vmem [shape: f32[9,4], index: 0, kind: input, shape index: {}]   ;;  %s124_s1 = inlined_call_operand.vmem [shape: f32[1,36], index: 1, kind: output, shape index: {}]  }
   0x1   :  { %v59_v0 = vld [vmem:[%s123_s0 + $0x8] sm:$0x1]   ;;  %v61_v1 = vld [vmem:[%s123_s0 + $0x6] sm:$0x1]   ;;  %v60_v2 = vld [vmem:[%s123_s0 + $0x7] sm:$0x1]  }
   0x2   :  { %7 = vrot.lane.b32.xlu0 %v59_v0, %s75_s10  ;;  %19 = vrot.lane.b32.xlu1 %v61_v1, %s76_s11  ;;  %v62_v3 = vld [vmem:[%s123_s0 + $0x5] sm:$0x1]   ;;  %v2_v4 = vld [vmem:[%s123_s0] sm:$0x1]   ;;  %s77_s18 = smov 28   ;;  %s78_s19 = smov 20  }
   0x3   :  { %4 = vst.msk [vmem:[#allocation0] sm:$0x1] %vm3_vm0, %v2_v4   ;;  %v63_v5 = vld [vmem:[%s123_s0 + $0x4] sm:$0x1]   ;;  %v64_v6 = vld [vmem:[%s123_s0 + $0x3] sm:$0x1]  }
   0x4   :  { %s79_s24 = smov 16   ;;  %s80_s25 = smov 12   ;;  %v65_v7 = vld [vmem:[%s123_s0 + $0x2] sm:$0x1]   ;;  %v66_v8 = vld [vmem:[%s123_s0 + $0x1] sm:$0x1]  }
   0x5   :  { %s81_s0 = smov 8   ;;  %s82_s30 = smov 4   ;;  %vm27_vm4 = vcmask 195744   ;;  %vm33_vm5 = vcmask 162944   ;;  %vm39_vm6 = vcmask 130144   ;;  %vm45_vm7 = vcmask 97344  }
   0x6   :  { %13 = vrot.lane.b32.xlu0 %v60_v2, %s77_s18  ;;  %25 = vrot.lane.b32.xlu1 %v62_v3, %s78_s19  ;;  %vm51_vm8 = vcmask 64544  }
   0xa   :  { %31 = vrot.lane.b32.xlu0 %v63_v5, %s79_s24  ;;  %37 = vrot.lane.b32.xlu1 %v64_v6, %s80_s25 }
   0xe   :  { %43 = vrot.lane.b32.xlu0 %v65_v7, %s81_s0  ;;  %49 = vrot.lane.b32.xlu1 %v66_v8, %s82_s30 }
  0x74   :  { %v8_v9 = vpop.permute.xlu0 %7   ;;  %v20_v10 = vpop.permute.xlu1 %19  }
  0x75   :  { %10 = vst.msk [vmem:[#allocation0] sm:$0x1] %vm9_vm1, %v8_v9  }
  0x78   :  { %v14_v11 = vpop.permute.xlu0 %13   ;;  %v26_v12 = vpop.permute.xlu1 %25  }
  0x79   :  { %16 = vst.msk [vmem:[#allocation0] sm:$0x1] %vm15_vm2, %v14_v11  }
  0x7a   :  { %22 = vst.msk [vmem:[#allocation0] sm:$0x1] %vm21_vm3, %v20_v10  }
  0x7b   :  { %28 = vst.msk [vmem:[#allocation0] sm:$0x1] %vm27_vm4, %v26_v12  }
  0x7c   :  { %v32_v13 = vpop.permute.xlu0 %31   ;;  %v38_v14 = vpop.permute.xlu1 %37  }
  0x7d   :  { %34 = vst.msk [vmem:[#allocation0] sm:$0x1] %vm33_vm5, %v32_v13  }
  0x7e   :  { %40 = vst.msk [vmem:[#allocation0] sm:$0x1] %vm39_vm6, %v38_v14  }
  0x80   :  { %v44_v15 = vpop.permute.xlu0 %43   ;;  %v50_v16 = vpop.permute.xlu1 %49  }
  0x81   :  { %46 = vst.msk [vmem:[#allocation0] sm:$0x1] %vm45_vm7, %v44_v15  }
  0x82   :  { %52 = vst.msk [vmem:[#allocation0] sm:$0x1] %vm51_vm8, %v50_v16  }
  0x89   :  { %v56_v17 = vld [vmem:[#allocation0] sm:$0x1] }
  0x8a   :  { %58 = vst [vmem:[%s124_s1] sm:$0x1] %v56_v17 }

// kernel: autoencoder_forward.9
= control target key start
LH: loop header
LB: loop body
LE: loop exit
PB: predicated region body
PF: predicated region fallthrough
CT: control target
= control target key end

     0   :  { %vm137_vm0 = vcmask 1044480   ;;  %vm138_vm1 = vcmask 1045504   ;;  %v526_v0 = vmov 0.0   ;;  %v527_v2 = vmov 65535   ;;  %s801_s1 = inlined_call_operand.vmem [shape: bf16[27,4], index: 1, kind: input, shape index: {}]   ;;  %s802_s0 = inlined_call_operand.vmem [shape: bf16[168,27], index: 0, kind: input, shape index: {}]   ;;  %s803_s3 = inlined_call_operand.vmem [shape: f32[2,4], index: 3, kind: output, shape index: {1}]   ;;  %s804_s2 = inlined_call_operand.vmem [shape: f32[168,4], index: 2, kind: output, shape index: {0}]  }
   0x1   :  { %458 = vmatprep.subr.bf16.mxu0 %v526_v0  ;;  %v513_v1 = vld [vmem:[%s801_s1] sm:$0xff]   ;;  %v139_v3 = vsel %vm137_vm0, 4294967295, %v527_v2  ;;  %506 = vmatprep.subr.bf16.mxu1 %v526_v0  ;;  %v514_v4 = vld [vmem:[%s801_s1 + $0x8] sm:$0x3f]   ;;  %vm528_vm2 = vmmov 0   ;;  %vm103_vm3 = vcmask 220160  }
   0x2   :  { %459 = vmatpush3.bf16.msra.mxu0 %v513_v1  ;;  %v140_v5 = vsel %vm138_vm1, %v139_v3, 0  ;;  %508 = vmatpush3.bf16.msra.mxu1 %v513_v1  ;;  %v515_v7 = vld [vmem:[%s802_s0] sm:$0xff]   ;;  %v519_v8 = vld [vmem:[%s802_s0 + $0x30] sm:$0xff]   ;;  %v516_v9 = vld [vmem:[%s802_s0 + $0x8] sm:$0xff]   ;;  %vm268_vm4 = vcmask 25600   ;;  %vm270_vm5 = vcmask 31744  }
   0x3   :  { %460 = vmatprep.subr.bf16.mxu0 %v526_v0  ;;  %v142_v6 = vand.u32 %v514_v4, %v140_v5  ;;  %462 = vmatprep.mubr.msk.bf16.mxu0 %vm528_vm2, %v526_v0  ;;  %v521_v10 = vld [vmem:[%s802_s0 + $0x38] sm:$0xff]   ;;  %v517_v11 = vld [vmem:[%s802_s0 + $0x10] sm:$0xff]   ;;  %v523_v12 = vld [vmem:[%s802_s0 + $0x40] sm:$0xff]   ;;  %269 = vst.msk [vmem:[%s803_s3] sm:$0x3] %vm268_vm4, %v526_v0  ;;  %vm387_vm6 = vcmask 1040384  }
   0x4   :  { %507 = vmatprep.subr.bf16.mxu1 %v526_v0  ;;  %486 = vmatprep.mubr.msk.bf16.mxu1 %vm528_vm2, %v526_v0  ;;  %v518_v13 = vld [vmem:[%s802_s0 + $0x18] sm:$0xff]   ;;  %v524_v14 = vld [vmem:[%s802_s0 + $0x48] sm:$0xff]   ;;  %v520_v15 = vld [vmem:[%s802_s0 + $0x20] sm:$0xff]  }
   0x5   :  { %v525_v16 = vld [vmem:[%s802_s0 + $0x50] ss:$0 sps:$4 sm:$0xff]   ;;  %v522_v17 = vld [vmem:[%s802_s0 + $0x28] sm:$0xff]  }
   0x6   :  { %461 = vmatpush3.bf16.msra.mxu0 %v142_v6  ;;  %509 = vmatpush3.bf16.msra.mxu1 %v142_v6 }
   0x9   :  { %463 = vmatmul.mubr.msk.bf16.vlgmr.msra.gmra.mrb[0].mxu0 %vm103_vm3, %v515_v7  ;;  %487 = vmatmul.mubr.msk.bf16.vlgmr.msra.gmra.mrb[0].mxu1 %vm103_vm3, %v519_v8 }
   0xa   :  { %466 = vmatprep.mubr.msk.bf16.mxu0 %vm528_vm2, %v526_v0  ;;  %490 = vmatprep.mubr.msk.bf16.mxu1 %vm528_vm2, %v526_v0 }
  0x11   :  { %467 = vmatmul.mubr.msk.bf16.gmra.mrb[4].mxu0 %vm103_vm3, %v516_v9  ;;  %491 = vmatmul.mubr.msk.bf16.gmra.mrb[4].mxu1 %vm103_vm3, %v521_v10 }
  0x12   :  { %470 = vmatprep.mubr.msk.bf16.mxu0 %vm528_vm2, %v526_v0  ;;  %494 = vmatprep.mubr.msk.bf16.mxu1 %vm528_vm2, %v526_v0 }
  0x19   :  { %471 = vmatmul.mubr.msk.bf16.gmra.mrb[8].mxu0 %vm103_vm3, %v517_v11  ;;  %495 = vmatmul.mubr.msk.bf16.gmra.mrb[8].mxu1 %vm103_vm3, %v523_v12 }
  0x1a   :  { %474 = vmatprep.mubr.msk.bf16.mxu0 %vm528_vm2, %v526_v0  ;;  %498 = vmatprep.mubr.msk.bf16.mxu1 %vm528_vm2, %v526_v0 }
  0x21   :  { %475 = vmatmul.mubr.msk.bf16.gmra.mrb[12].mxu0 %vm103_vm3, %v518_v13  ;;  %499 = vmatmul.mubr.msk.bf16.gmra.mrb[12].mxu1 %vm103_vm3, %v524_v14 }
  0x22   :  { %478 = vmatprep.mubr.msk.bf16.mxu0 %vm528_vm2, %v526_v0  ;;  %502 = vmatprep.mubr.msk.bf16.mxu1 %vm528_vm2, %v526_v0 }
  0x29   :  { %479 = vmatmul.mubr.msk.bf16.gmra.mrb[16].mxu0 %vm103_vm3, %v520_v15  ;;  %503 = vmatmul.mubr.msk.bf16.gmra.mrb[16].mxu1 %vm103_vm3, %v525_v16 }
  0x2a   :  { %482 = vmatprep.mubr.msk.bf16.mxu0 %vm528_vm2, %v526_v0 }
  0x31   :  { %483 = vmatmul.mubr.msk.bf16.gmra.mrb[20].mxu0 %vm103_vm3, %v522_v17 }
  0xdc   :  { %v178_v18 = vpop.f32.mrb[0].mxu0  ;;  %v614_v19 = vpop.f32.mrb[0].mxu1 }
  0xdd   :  { %v318_v20 = vmul.f32 %v178_v18, %v178_v18  ;;  %392 = vst.msk [vmem:[%s804_s2] sm:$0xff] %vm270_vm5, %v178_v18  ;;  %v464_v21 = vpop.f32.mrb[1].mxu0  ;;  %404 = vst.msk [vmem:[%s804_s2 + $0x60] sm:$0xff] %vm270_vm5, %v614_v19  ;;  %v488_v22 = vpop.f32.mrb[1].mxu1  ;;  %v271_v25 = vsel %vm270_vm5, %v178_v18, 0.0 }
  0xde   :  { %v181_v23 = vpop.f32.mrb[2].mxu0  ;;  %v625_v24 = vpop.f32.mrb[2].mxu1 }
  0xdf   :  { %v272_v26 = vsel %vm270_vm5, %v181_v23, 0.0  ;;  %v319_v27 = vmul.f32 %v181_v23, %v181_v23  ;;  %393 = vst.msk [vmem:[%s804_s2 + $0x8] sm:$0xff] %vm270_vm5, %v181_v23  ;;  %v465_v28 = vpop.f32.mrb[3].mxu0  ;;  %405 = vst.msk [vmem:[%s804_s2 + $0x68] sm:$0xff] %vm270_vm5, %v625_v24  ;;  %v489_v29 = vpop.f32.mrb[3].mxu1  ;;  %v339_v31 = vsel %vm270_vm5, %v318_v20, 0.0 }
  0xe0   :  { %v273_v30 = vadd.f32 %v272_v26, %v271_v25 }
  0xe1   :  { %v340_v32 = vsel %vm270_vm5, %v319_v27, 0.0 }
  0xe2   :  { %v341_v33 = vadd.f32 %v340_v32, %v339_v31 }
  0xe4   :  { %v186_v34 = vpop.f32.mrb[4].mxu0  ;;  %v640_v35 = vpop.f32.mrb[4].mxu1 }
  0xe5   :  { %v274_v36 = vsel %vm270_vm5, %v186_v34, 0.0  ;;  %v320_v37 = vmul.f32 %v186_v34, %v186_v34  ;;  %394 = vst.msk [vmem:[%s804_s2 + $0x10] sm:$0xff] %vm270_vm5, %v186_v34  ;;  %v468_v38 = vpop.f32.mrb[5].mxu0  ;;  %406 = vst.msk [vmem:[%s804_s2 + $0x70] sm:$0xff] %vm270_vm5, %v640_v35  ;;  %v492_v39 = vpop.f32.mrb[5].mxu1 }
  0xe6   :  { %v275_v40 = vadd.f32 %v274_v36, %v273_v30  ;;  %v189_v41 = vpop.f32.mrb[6].mxu0  ;;  %v652_v42 = vpop.f32.mrb[6].mxu1 }
  0xe7   :  { %v342_v43 = vsel %vm270_vm5, %v320_v37, 0.0  ;;  %v276_v44 = vsel %vm270_vm5, %v189_v41, 0.0  ;;  %v321_v45 = vmul.f32 %v189_v41, %v189_v41  ;;  %395 = vst.msk [vmem:[%s804_s2 + $0x18] sm:$0xff] %vm270_vm5, %v189_v41  ;;  %v469_v46 = vpop.f32.mrb[7].mxu0  ;;  %407 = vst.msk [vmem:[%s804_s2 + $0x78] sm:$0xff] %vm270_vm5, %v652_v42  ;;  %v493_v47 = vpop.f32.mrb[7].mxu1 }
  0xe8   :  { %v343_v48 = vadd.f32 %v342_v43, %v341_v33  ;;  %v277_v49 = vadd.f32 %v276_v44, %v275_v40 }
  0xe9   :  { %v344_v50 = vsel %vm270_vm5, %v321_v45, 0.0 }
  0xea   :  { %v345_v51 = vadd.f32 %v344_v50, %v343_v48 }
  0xec   :  { %v194_v52 = vpop.f32.mrb[8].mxu0  ;;  %v666_v53 = vpop.f32.mrb[8].mxu1 }
  0xed   :  { %v278_v54 = vsel %vm270_vm5, %v194_v52, 0.0  ;;  %v322_v55 = vmul.f32 %v194_v52, %v194_v52  ;;  %396 = vst.msk [vmem:[%s804_s2 + $0x20] sm:$0xff] %vm270_vm5, %v194_v52  ;;  %v472_v56 = vpop.f32.mrb[9].mxu0  ;;  %408 = vst.msk [vmem:[%s804_s2 + $0x80] sm:$0xff] %vm270_vm5, %v666_v53  ;;  %v496_v57 = vpop.f32.mrb[9].mxu1  ;;  %v330_v52 = vmul.f32 %v614_v19, %v614_v19 }
  0xee   :  { %v279_v58 = vadd.f32 %v278_v54, %v277_v49  ;;  %v197_v59 = vpop.f32.mrb[10].mxu0  ;;  %v678_v60 = vpop.f32.mrb[10].mxu1 }
  0xef   :  { %v346_v61 = vsel %vm270_vm5, %v322_v55, 0.0  ;;  %v280_v62 = vsel %vm270_vm5, %v197_v59, 0.0  ;;  %v323_v63 = vmul.f32 %v197_v59, %v197_v59  ;;  %397 = vst.msk [vmem:[%s804_s2 + $0x28] sm:$0xff] %vm270_vm5, %v197_v59  ;;  %v473_v0 = vpop.f32.mrb[11].mxu0  ;;  %409 = vst.msk [vmem:[%s804_s2 + $0x88] sm:$0xff] %vm270_vm5, %v678_v60  ;;  %v497_v1 = vpop.f32.mrb[11].mxu1 }
  0xf0   :  { %v347_v2 = vadd.f32 %v346_v61, %v345_v51  ;;  %v281_v3 = vadd.f32 %v280_v62, %v279_v58  ;;  %v294_v61 = vsel %vm270_vm5, %v614_v19, 0.0  ;;  %v331_v62 = vmul.f32 %v625_v24, %v625_v24 }
  0xf1   :  { %v348_v4 = vsel %vm270_vm5, %v323_v63, 0.0  ;;  %v298_v19 = vsel %vm270_vm5, %v640_v35, 0.0 }
  0xf2   :  { %v349_v5 = vadd.f32 %v348_v4, %v347_v2  ;;  %v362_v2 = vsel %vm270_vm5, %v330_v52, 0.0  ;;  %v332_v4 = vmul.f32 %v640_v35, %v640_v35  ;;  %v302_v35 = vsel %vm270_vm5, %v666_v53, 0.0 }
  0xf4   :  { %v202_v6 = vpop.f32.mrb[12].mxu0  ;;  %v692_v7 = vpop.f32.mrb[12].mxu1 }
  0xf5   :  { %v282_v8 = vsel %vm270_vm5, %v202_v6, 0.0  ;;  %v324_v9 = vmul.f32 %v202_v6, %v202_v6  ;;  %398 = vst.msk [vmem:[%s804_s2 + $0x30] sm:$0xff] %vm270_vm5, %v202_v6  ;;  %v476_v10 = vpop.f32.mrb[13].mxu0  ;;  %410 = vst.msk [vmem:[%s804_s2 + $0x90] sm:$0xff] %vm270_vm5, %v692_v7  ;;  %v500_v11 = vpop.f32.mrb[13].mxu1 }
  0xf6   :  { %v283_v12 = vadd.f32 %v282_v8, %v281_v3  ;;  %v205_v13 = vpop.f32.mrb[14].mxu0  ;;  %v704_v14 = vpop.f32.mrb[14].mxu1  ;;  %v296_v3 = vsel %vm270_vm5, %v625_v24, 0.0  ;;  %v364_v8 = vsel %vm270_vm5, %v331_v62, 0.0  ;;  %v300_v24 = vsel %vm270_vm5, %v652_v42, 0.0 }
  0xf7   :  { %v350_v15 = vsel %vm270_vm5, %v324_v9, 0.0  ;;  %v284_v16 = vsel %vm270_vm5, %v205_v13, 0.0  ;;  %v325_v17 = vmul.f32 %v205_v13, %v205_v13  ;;  %399 = vst.msk [vmem:[%s804_s2 + $0x38] sm:$0xff] %vm270_vm5, %v205_v13  ;;  %v477_v18 = vpop.f32.mrb[15].mxu0  ;;  %411 = vst.msk [vmem:[%s804_s2 + $0x98] sm:$0xff] %vm270_vm5, %v704_v14  ;;  %v501_v20 = vpop.f32.mrb[15].mxu1  ;;  %v333_v9 = vmul.f32 %v652_v42, %v652_v42 }
  0xf8   :  { %v351_v21 = vadd.f32 %v350_v15, %v349_v5  ;;  %v285_v22 = vadd.f32 %v284_v16, %v283_v12  ;;  %v366_v12 = vsel %vm270_vm5, %v332_v4, 0.0  ;;  %v334_v13 = vmul.f32 %v666_v53, %v666_v53 }
  0xf9   :  { %v352_v23 = vsel %vm270_vm5, %v325_v17, 0.0  ;;  %v368_v17 = vsel %vm270_vm5, %v333_v9, 0.0  ;;  %v335_v18 = vmul.f32 %v678_v60, %v678_v60  ;;  %v304_v42 = vsel %vm270_vm5, %v678_v60, 0.0 }
  0xfa   :  { %v353_v25 = vadd.f32 %v352_v23, %v351_v21  ;;  %v336_v23 = vmul.f32 %v692_v7, %v692_v7  ;;  %v306_v53 = vsel %vm270_vm5, %v692_v7, 0.0 }
  0xfc   :  { %v210_v26 = vpop.f32.mrb[16].mxu0  ;;  %v718_v27 = vpop.f32.mrb[16].mxu1  ;;  %v374_v60 = vsel %vm270_vm5, %v336_v23, 0.0 }
  0xfd   :  { %v286_v28 = vsel %vm270_vm5, %v210_v26, 0.0  ;;  %v326_v29 = vmul.f32 %v210_v26, %v210_v26  ;;  %400 = vst.msk [vmem:[%s804_s2 + $0x40] sm:$0xff] %vm270_vm5, %v210_v26  ;;  %v480_v30 = vpop.f32.mrb[17].mxu0  ;;  %412 = vst.msk [vmem:[%s804_s2 + $0xa0] sm:$0xff] %vm270_vm5, %v718_v27  ;;  %v504_v31 = vpop.f32.mrb[17].mxu1 }
  0xfe   :  { %v287_v32 = vadd.f32 %v286_v28, %v285_v22  ;;  %v213_v33 = vpop.f32.mrb[18].mxu0  ;;  %v261_v34 = vpop.f32.mrb[18].mxu1  ;;  %v370_v22 = vsel %vm270_vm5, %v334_v13, 0.0  ;;  %v372_v28 = vsel %vm270_vm5, %v335_v18, 0.0  ;;  %v338_v30 = vmul.f32 %v718_v27, %v718_v27 }
  0xff   :  { %v354_v36 = vsel %vm270_vm5, %v326_v29, 0.0  ;;  %v288_v37 = vsel %vm270_vm5, %v213_v33, 0.0  ;;  %v327_v38 = vmul.f32 %v213_v33, %v213_v33  ;;  %401 = vst.msk [vmem:[%s804_s2 + $0x48] sm:$0xff] %vm270_vm5, %v213_v33  ;;  %v481_v39 = vpop.f32.mrb[19].mxu0  ;;  %v505_v40 = vpop.f32.mrb[19].mxu1  ;;  %v337_v29 = vmul.f32 %v704_v14, %v704_v14 }
 0x100   :  { %v355_v41 = vadd.f32 %v354_v36, %v353_v25  ;;  %v289_v43 = vadd.f32 %v288_v37, %v287_v32  ;;  %v308_v33 = vsel %vm270_vm5, %v704_v14, 0.0  ;;  %v310_v34 = vsel %vm270_vm5, %v718_v27, 0.0 }
 0x101   :  { %v356_v44 = vsel %vm270_vm5, %v327_v38, 0.0  ;;  %v376_v7 = vsel %vm270_vm5, %v337_v29, 0.0  ;;  %v378_v38 = vsel %vm270_vm5, %v338_v30, 0.0 }
 0x102   :  { %v357_v45 = vadd.f32 %v356_v44, %v355_v41 }
 0x104   :  { %v218_v46 = vpop.f32.mrb[20].mxu0 }
 0x105   :  { %v290_v47 = vsel %vm270_vm5, %v218_v46, 0.0  ;;  %v328_v48 = vmul.f32 %v218_v46, %v218_v46  ;;  %402 = vst.msk [vmem:[%s804_s2 + $0x50] sm:$0xff] %vm270_vm5, %v218_v46  ;;  %v484_v49 = vpop.f32.mrb[21].mxu0 }
 0x106   :  { %v291_v50 = vadd.f32 %v290_v47, %v289_v43  ;;  %v221_v51 = vpop.f32.mrb[22].mxu0 }
 0x107   :  { %v358_v54 = vsel %vm270_vm5, %v328_v48, 0.0  ;;  %v292_v55 = vsel %vm270_vm5, %v221_v51, 0.0  ;;  %v329_v56 = vmul.f32 %v221_v51, %v221_v51  ;;  %403 = vst.msk [vmem:[%s804_s2 + $0x58] sm:$0xff] %vm270_vm5, %v221_v51  ;;  %v485_v57 = vpop.f32.mrb[23].mxu0 }
 0x108   :  { %v359_v58 = vadd.f32 %v358_v54, %v357_v45  ;;  %v293_v59 = vadd.f32 %v292_v55, %v291_v50  ;;  %v386_v54 = vld [vmem:[%s803_s3] sm:$0x3] }
 0x109   :  { %v360_v63 = vsel %vm270_vm5, %v329_v56, 0.0 }
 0x10a   :  { %v295_v0 = vadd.f32 %v294_v61, %v293_v59  ;;  %v361_v1 = vadd.f32 %v360_v63, %v359_v58 }
 0x10c   :  { %v297_v5 = vadd.f32 %v296_v3, %v295_v0  ;;  %v363_v6 = vadd.f32 %v362_v2, %v361_v1 }
 0x10e   :  { %v365_v10 = vadd.f32 %v364_v8, %v363_v6  ;;  %v299_v11 = vadd.f32 %v298_v19, %v297_v5 }
 0x110   :  { %v301_v15 = vadd.f32 %v300_v24, %v299_v11  ;;  %v367_v16 = vadd.f32 %v366_v12, %v365_v10 }
 0x112   :  { %v303_v20 = vadd.f32 %v302_v35, %v301_v15  ;;  %v369_v21 = vadd.f32 %v368_v17, %v367_v16 }
 0x114   :  { %v305_v25 = vadd.f32 %v304_v42, %v303_v20  ;;  %v371_v26 = vadd.f32 %v370_v22, %v369_v21 }
 0x116   :  { %v373_v31 = vadd.f32 %v372_v28, %v371_v26  ;;  %v307_v32 = vadd.f32 %v306_v53, %v305_v25 }
 0x118   :  { %v375_v36 = vadd.f32 %v374_v60, %v373_v31  ;;  %v309_v37 = vadd.f32 %v308_v33, %v307_v32 }
 0x11a   :  { %v377_v39 = vadd.f32 %v376_v7, %v375_v36  ;;  %v311_v40 = vadd.f32 %v310_v34, %v309_v37 }
 0x11c   :  { %v312_v41 = vrot.slane %v311_v40, 4  ;;  %v379_v43 = vadd.f32 %v378_v38, %v377_v39 }
 0x11e   :  { %v313_v44 = vadd.f32 %v312_v41, %v311_v40  ;;  %v380_v45 = vrot.slane %v379_v43, 4 }
 0x120   :  { %v314_v46 = vrot.slane %v313_v44, 2  ;;  %v381_v47 = vadd.f32 %v380_v45, %v379_v43 }
 0x122   :  { %v315_v48 = vadd.f32 %v314_v46, %v313_v44  ;;  %v382_v49 = vrot.slane %v381_v47, 2 }
 0x124   :  { %v316_v14 = vrot.slane %v315_v48, 1  ;;  %v383_v50 = vadd.f32 %v382_v49, %v381_v47 }
 0x126   :  { %v384_v51 = vrot.slane %v383_v50, 1  ;;  %v317_v27 = vadd.f32 %v316_v14, %v315_v48 }
 0x128   :  { %v385_v52 = vadd.f32 %v384_v51, %v383_v50 }
 0x12a   :  { %v388_v55 = vsel %vm387_vm6, %v317_v27, %v385_v52 }
 0x12b   :  { %v389_v56 = vadd.f32 %v388_v55, %v386_v54 }
 0x12d   :  { %391 = vst.msk [vmem:[%s803_s3] sm:$0x3] %vm268_vm4, %v389_v56 }

// kernel: autoencoder_forward.10
= control target key start
LH: loop header
LB: loop body
LE: loop exit
PB: predicated region body
PF: predicated region fallthrough
CT: control target
= control target key end

     0   :  { %vm40_vm0 = vcmask 293888   ;;  %s94_s0 = inlined_call_operand.vmem [shape: f32[24,36], index: 0, kind: input, shape index: {}]   ;;  %s95_s1 = inlined_call_operand.vmem [shape: f32[1,36], index: 1, kind: input, shape index: {}]   ;;  %s96_s2 = inlined_call_operand.vmem [shape: f32[1,36], index: 2, kind: input, shape index: {}]   ;;  %s97_s3 = inlined_call_operand.vmem [shape: f32[24,36], index: 3, kind: output, shape index: {}]  }
   0x1   :  { %v14_v0 = vld [vmem:[%s94_s0] sm:$0xff]  ;;  %v15_v4 = vld [vmem:[%s94_s0 + $0x8] sm:$0xff]  ;;  %v16_v5 = vld [vmem:[%s94_s0 + $0x10] sm:$0xff] }
   0x2   :  { %v48_v1 = vld [vmem:[%s95_s1] ss:$0 sm:$0xff] }
   0x3   :  { %v49_v2 = vld [vmem:[%s96_s2] ss:$0 sm:$0xff]  ;;  %v24_v3 = vmul.f32 %v48_v1, %v14_v0  ;;  %v25_v6 = vmul.f32 %v48_v1, %v15_v4  ;;  %v26_v7 = vmul.f32 %v48_v1, %v16_v5 }
   0x5   :  { %v34_v8 = vadd.f32 %v49_v2, %v24_v3  ;;  %v35_v9 = vadd.f32 %v49_v2, %v25_v6  ;;  %v36_v10 = vadd.f32 %v49_v2, %v26_v7 }
   0x7   :  { %v37_v11 = vmax.f32 %v34_v8, 0.0  ;;  %v38_v12 = vmax.f32 %v35_v9, 0.0  ;;  %v39_v13 = vmax.f32 %v36_v10, 0.0 }
   0x9   :  { %41 = vst.msk [vmem:[%s97_s3] sm:$0xff] %vm40_vm0, %v37_v11  ;;  %42 = vst.msk [vmem:[%s97_s3 + $0x8] sm:$0xff] %vm40_vm0, %v38_v12 }
   0xa   :  { %43 = vst.msk [vmem:[%s97_s3 + $0x10] sm:$0xff] %vm40_vm0, %v39_v13 }

// kernel: tile.48
= control target key start
LH: loop header
LB: loop body
LE: loop exit
PB: predicated region body
PF: predicated region fallthrough
CT: control target
= control target key end

     0   :  { %s22_s0 = inlined_call_operand.vmem [shape: f32[8], index: 0, kind: input, shape index: {}]   ;;  %s23_s1 = inlined_call_operand.vmem [shape: f32[4,8], index: 1, kind: output, shape index: {}]  }
   0x1   :  { %v4_v0 = vld [vmem:[%s22_s0] ss:$0 sm:$0xff] }
   0x2   :  { %5 = vst [vmem:[%s23_s1] sm:$0xf] %v4_v0 }

// kernel: tile.49
= control target key start
LH: loop header
LB: loop body
LE: loop exit
PB: predicated region body
PF: predicated region fallthrough
CT: control target
= control target key end

     0   :  { %vm7_vm0 = vcmask 64512   ;;  %s37_s8 = smov 8   ;;  %s38_s9 = smov 16   ;;  %vm13_vm1 = vcmask 261312   ;;  %vm19_vm2 = vcmask 195712   ;;  %vm25_vm3 = vcmask 130112   ;;  %s55_s0 = inlined_call_operand.vmem [shape: f32[4,8], index: 0, kind: input, shape index: {}]   ;;  %s56_s1 = inlined_call_operand.vmem [shape: f32[1,32], index: 1, kind: output, shape index: {}]  }
   0x1   :  { %v4_v0 = vld [vmem:[%s55_s0] sm:$0xf]  ;;  %s36_s0 = smov 24  }
   0x2   :  { %5 = vst [vmem:[#allocation1] sm:$0xf] %v4_v0 }
   0x9   :  { %v10_v1 = vld [vmem:[#allocation1 + $0x3] sm:$0x1]   ;;  %v22_v2 = vld [vmem:[#allocation1 + $0x1] sm:$0x1]   ;;  %v6_v3 = vld [vmem:[#allocation1] sm:$0x1]  }
   0xa   :  { %11 = vrot.lane.b32.xlu0 %v10_v1, %s36_s0  ;;  %23 = vrot.lane.b32.xlu1 %v22_v2, %s37_s8  ;;  %v16_v4 = vld [vmem:[#allocation1 + $0x2] sm:$0x1]   ;;  %8 = vst.msk [vmem:[#allocation0] sm:$0x1] %vm7_vm0, %v6_v3  }
   0xe   :  { %17 = vrot.lane.b32.xlu0 %v16_v4, %s38_s9 }
  0x7c   :  { %v12_v5 = vpop.permute.xlu0 %11   ;;  %v24_v6 = vpop.permute.xlu1 %23  }
  0x7d   :  { %14 = vst.msk [vmem:[#allocation0] sm:$0x1] %vm13_vm1, %v12_v5  }
  0x80   :  { %v18_v7 = vpop.permute.xlu0 %17  }
  0x81   :  { %20 = vst.msk [vmem:[#allocation0] sm:$0x1] %vm19_vm2, %v18_v7  }
  0x82   :  { %26 = vst.msk [vmem:[#allocation0] sm:$0x1] %vm25_vm3, %v24_v6  }
  0x89   :  { %v30_v8 = vld [vmem:[#allocation0] sm:$0x1] }
  0x8a   :  { %32 = vst [vmem:[%s56_s1] sm:$0x1] %v30_v8 }

// kernel: autoencoder_forward.12
= control target key start
LH: loop header
LB: loop body
LE: loop exit
PB: predicated region body
PF: predicated region fallthrough
CT: control target
= control target key end

     0   :  { %vm32_vm0 = vcmask 261120   ;;  %s72_s0 = inlined_call_operand.vmem [shape: f32[8,32], index: 0, kind: input, shape index: {}]   ;;  %s73_s1 = inlined_call_operand.vmem [shape: f32[1,32], index: 1, kind: input, shape index: {}]   ;;  %s74_s2 = inlined_call_operand.vmem [shape: f32[1,32], index: 2, kind: input, shape index: {}]   ;;  %s75_s3 = inlined_call_operand.vmem [shape: f32[8,32], index: 3, kind: output, shape index: {}]  }
   0x1   :  { %v14_v0 = vld [vmem:[%s72_s0] sm:$0xff] }
   0x2   :  { %v38_v1 = vld [vmem:[%s73_s1] ss:$0 sm:$0xff] }
   0x3   :  { %v39_v2 = vld [vmem:[%s74_s2] ss:$0 sm:$0xff]  ;;  %v22_v3 = vmul.f32 %v38_v1, %v14_v0 }
   0x5   :  { %v30_v4 = vadd.f32 %v39_v2, %v22_v3 }
   0x7   :  { %v31_v5 = vmax.f32 %v30_v4, 0.0 }
   0x9   :  { %33 = vst.msk [vmem:[%s75_s3] sm:$0xff] %vm32_vm0, %v31_v5 }

// kernel: autoencoder_forward.11
= control target key start
LH: loop header
LB: loop body
LE: loop exit
PB: predicated region body
PF: predicated region fallthrough
CT: control target
= control target key end

     0   :  { %vm48_vm0 = vcmask 293888   ;;  %vm55_vm1 = vcmask 1041408   ;;  %vm112_vm2 = vcmask 58368   ;;  %v192_v6 = vmov 0.0   ;;  %s263_s1 = inlined_call_operand.vmem [shape: bf16[36,8], index: 1, kind: input, shape index: {}]   ;;  %s264_s0 = inlined_call_operand.vmem [shape: bf16[32,36], index: 0, kind: input, shape index: {}]   ;;  %s265_s3 = inlined_call_operand.vmem [shape: f32[2,8], index: 3, kind: output, shape index: {1}]   ;;  %s266_s2 = inlined_call_operand.vmem [shape: f32[32,8], index: 2, kind: output, shape index: {0}]  }
   0x1   :  { %v187_v0 = vld [vmem:[%s263_s1] sm:$0xff]   ;;  %v188_v1 = vld [vmem:[%s263_s1 + $0x8] sm:$0xff]   ;;  %v189_v3 = vld [vmem:[%s263_s1 + $0x10] ss:$0 sps:$4 sm:$0x33]   ;;  %vm114_vm3 = vcmask 64512  }
   0x2   :  { %175 = vmatprep.subr.bf16.mxu0 %v187_v0  ;;  %v190_v2 = vld [vmem:[%s264_s0] sm:$0xff]   ;;  %v57_v4 = vsel %vm55_vm1, %v189_v3, 0  ;;  %v191_v5 = vld [vmem:[%s264_s0 + $0x8] sm:$0xff]   ;;  %113 = vst.msk [vmem:[%s265_s3] sm:$0x3] %vm112_vm2, %v192_v6  ;;  %vm146_vm4 = vcmask 1040384  }
   0x3   :  { %176 = vmatpush3.bf16.msra.mxu0 %v187_v0  ;;  %181 = vmatprep.mubr.msk.bf16.mxu0 %vm48_vm0, %v190_v2 }
   0x4   :  { %177 = vmatprep.subr.bf16.mxu0 %v188_v1 }
   0x7   :  { %178 = vmatpush3.bf16.msra.mxu0 %v188_v1 }
   0x8   :  { %185 = vmatprep.subr.msk.bf16.mxu0 %vm55_vm1, %v189_v3 }
   0x9   :  { %v145_v41 = vld [vmem:[%s265_s3] sm:$0x3] }
   0xb   :  { %180 = vmatpush3.bf16.msra.mxu0 %v57_v4 }
   0xe   :  { %182 = vmatmul.mubr.msk.bf16.vlgmr.msra.gmra.mrb[0].mxu0 %vm48_vm0, %v191_v5 }
  0xe1   :  { %v183_v7 = vpop.f32.mrb[0].mxu0 }
  0xe2   :  { %153 = vst.msk [vmem:[%s266_s2 + $0x10] sm:$0xff] %vm114_vm3, %v183_v7  ;;  %v93_v8 = vpop.f32.mrb[1].mxu0  ;;  %v130_v12 = vmul.f32 %v183_v7, %v183_v7  ;;  %v118_v17 = vsel %vm114_vm3, %v183_v7, 0.0 }
  0xe3   :  { %v128_v9 = vmul.f32 %v93_v8, %v93_v8  ;;  %151 = vst.msk [vmem:[%s266_s2] sm:$0xff] %vm114_vm3, %v93_v8  ;;  %v184_v10 = vpop.f32.mrb[2].mxu0  ;;  %v115_v13 = vsel %vm114_vm3, %v93_v8, 0.0 }
  0xe4   :  { %154 = vst.msk [vmem:[%s266_s2 + $0x18] sm:$0xff] %vm114_vm3, %v184_v10  ;;  %v96_v11 = vpop.f32.mrb[3].mxu0  ;;  %v131_v19 = vmul.f32 %v184_v10, %v184_v10  ;;  %v135_v23 = vsel %vm114_vm3, %v130_v12, 0.0  ;;  %v120_v24 = vsel %vm114_vm3, %v184_v10, 0.0 }
  0xe5   :  { %v116_v14 = vsel %vm114_vm3, %v96_v11, 0.0  ;;  %v129_v15 = vmul.f32 %v96_v11, %v96_v11  ;;  %152 = vst.msk [vmem:[%s266_s2 + $0x8] sm:$0xff] %vm114_vm3, %v96_v11  ;;  %v132_v18 = vsel %vm114_vm3, %v128_v9, 0.0 }
  0xe6   :  { %v117_v16 = vadd.f32 %v116_v14, %v115_v13  ;;  %v137_v27 = vsel %vm114_vm3, %v131_v19, 0.0 }
  0xe7   :  { %v133_v20 = vsel %vm114_vm3, %v129_v15, 0.0 }
  0xe8   :  { %v119_v21 = vadd.f32 %v118_v17, %v117_v16  ;;  %v134_v22 = vadd.f32 %v133_v20, %v132_v18 }
  0xea   :  { %v121_v25 = vadd.f32 %v120_v24, %v119_v21  ;;  %v136_v26 = vadd.f32 %v135_v23, %v134_v22 }
  0xec   :  { %v122_v28 = vrot.slane %v121_v25, 4  ;;  %v138_v29 = vadd.f32 %v137_v27, %v136_v26 }
  0xee   :  { %v123_v30 = vadd.f32 %v122_v28, %v121_v25  ;;  %v139_v31 = vrot.slane %v138_v29, 4 }
  0xf0   :  { %v124_v32 = vrot.slane %v123_v30, 2  ;;  %v140_v33 = vadd.f32 %v139_v31, %v138_v29 }
  0xf2   :  { %v125_v34 = vadd.f32 %v124_v32, %v123_v30  ;;  %v141_v35 = vrot.slane %v140_v33, 2 }
  0xf4   :  { %v126_v36 = vrot.slane %v125_v34, 1  ;;  %v142_v37 = vadd.f32 %v141_v35, %v140_v33 }
  0xf6   :  { %v143_v38 = vrot.slane %v142_v37, 1  ;;  %v127_v39 = vadd.f32 %v126_v36, %v125_v34 }
  0xf8   :  { %v144_v40 = vadd.f32 %v143_v38, %v142_v37 }
  0xfa   :  { %v147_v42 = vsel %vm146_vm4, %v127_v39, %v144_v40 }
  0xfb   :  { %v148_v43 = vadd.f32 %v147_v42, %v145_v41 }
  0xfd   :  { %150 = vst.msk [vmem:[%s265_s3] sm:$0x3] %vm112_vm2, %v148_v43 }

// kernel: autoencoder_forward.13
= control target key start
LH: loop header
LB: loop body
LE: loop exit
PB: predicated region body
PF: predicated region fallthrough
CT: control target
= control target key end

     0   :  { %12 = vsyncpa [#allocation3], 0  ;;  %s897_s21 = smov 0   ;;  %s899_s22 = smov 0   ;;  %s1004_s0 = inlined_call_operand.vmem [shape: bf16[2,128], index: 0, kind: input, shape index: {}]   ;;  %s1005_s1 = inlined_call_operand.vmem [shape: bf16[128,32], index: 1, kind: input, shape index: {}]   ;;  %s1006_s2 = inlined_call_operand.vmem [shape: f32[1,32], index: 2, kind: input, shape index: {}]   ;;  %s1007_s3 = inlined_call_operand.vmem [shape: bf16[32,128], index: 3, kind: input, shape index: {}]   ;;  %s1008_s4 = inlined_call_operand.vmem [shape: f32[1,128], index: 4, kind: input, shape index: {}]   ;;  %s1009_s5 = inlined_call_operand.hbm [shape: f32[2,32], index: 5, kind: output, shape index: {0}]   ;;  %s1010_s6 = inlined_call_operand.vmem [shape: f32[2,128], index: 6, kind: output, shape index: {1}]  }
   0x1   :  { %s901_s23 = smov 0  }
   0x2 LB: > { %s684_s24 = sadd.s32 4294967295, %s854_s23   ;;  %s30_s25 = sadd.s32 1, %s850_s22  ;;  %s854_s23 = sphi %s901_s23, %s18_s23   ;;  %s850_s22 = sphi %s899_s22, %s1013_s22   ;;  %s846_s21 = sphi %s897_s21, %s1012_s21  }
   0x3   : > { %p32_p0 = scmp.ge.s32.totalorder %s30_s25, 2  ;;  %p692_p1 = scmp.ge.s32.totalorder %s854_s23, 1 }
   0x4   : > { %p275_p2 = scmp.lt.s32.totalorder %s854_s23, 3 }
   0x5   : > { %s1015_s25 = smov (%p32_p0, %s30_s25), 0 }
   0x6   : > { %p276_p3 = pnand %p692_p1, %p275_p2 }
   0x7   : > { %p356_p4 = scmp.eq.s32.totalorder (!%p276_p3), %s846_s21, 0 }
   0x8   : > { %279 = sbr.rel (%p276_p3) target bundleno = 535 (0x217), region = 40 }
   0xf   : > { %361 = sbr.rel (!%p356_p4) target bundleno = 22 (0x16), region = 44  ;;  %vm362_vm0 = vcmask (%p356_p4), 254976   ;;  %v856_v0 = vmov (%p356_p4), 0.0  }
  0x10   : > { %363 = vst.msk [vmem:[#allocation2] sm:$0x3] (%p356_p4), %vm362_vm0, %v856_v0 }
  0x16 PF: > { %p694_p5 = scmp.ne.s32.totalorder %s846_s21, 0 }
  0x17   : > { %v792_v1 = vld [vmem:[%s1005_s1] sm:$0xff] (!%p694_p5)   ;;  %v857_v2 = vmov (!%p694_p5), 0.0   ;;  %v793_v3 = vld [vmem:[%s1005_s1 + $0x8] sm:$0xff] (!%p694_p5)   ;;  %vm858_vm1 = vmmov (!%p694_p5), 0   ;;  %v794_v4 = vld [vmem:[%s1005_s1 + $0x10] sm:$0xff] (!%p694_p5)   ;;  %vm474_vm2 = vcmask (!%p694_p5), 254976  }
  0x18   : > { %366 = sbr.rel (%p694_p5) target bundleno = 271 (0x10f), region = 48  ;;  %728 = vmatprep.subr.bf16.mxu0 (!%p694_p5), %v857_v2  ;;  %744 = vmatprep.mubr.msk.bf16.mxu0 (!%p694_p5), %vm858_vm1, %v857_v2  ;;  %v795_v5 = vld [vmem:[%s1005_s1 + $0x18] sm:$0xff] (!%p694_p5)   ;;  %v796_v6 = vld [vmem:[%s1005_s1 + $0x20] sm:$0xff] (!%p694_p5)   ;;  %v797_v7 = vld [vmem:[%s1005_s1 + $0x28] sm:$0xff] (!%p694_p5)  }
  0x19   : > { %729 = vmatpush3.bf16.msra.mxu0 (!%p694_p5), %v792_v1  ;;  %v798_v8 = vld [vmem:[%s1005_s1 + $0x30] sm:$0xff] (!%p694_p5)   ;;  %v799_v9 = vld [vmem:[%s1005_s1 + $0x38] sm:$0xff] (!%p694_p5)   ;;  %v368_v10 = vld [vmem:[%s1004_s0] sm:$0x1] (!%p694_p5) }
  0x1a   : > { %730 = vmatprep.subr.bf16.mxu0 (!%p694_p5), %v857_v2  ;;  %v367_v11 = vld [vmem:[#allocation2] sm:$0x3] (!%p694_p5) }
  0x1d   : > { %731 = vmatpush3.bf16.msra.mxu0 (!%p694_p5), %v793_v3 }
  0x1e   : > { %732 = vmatprep.subr.bf16.mxu0 (!%p694_p5), %v857_v2 }
  0x21   : > { %733 = vmatpush3.bf16.msra.mxu0 %v794_v4 }
  0x22   : > { %734 = vmatprep.subr.bf16.mxu0 %v857_v2 }
  0x25   : > { %735 = vmatpush3.bf16.msra.mxu0 %v795_v5 }
  0x26   : > { %736 = vmatprep.subr.bf16.mxu0 %v857_v2 }
  0x29   : > { %737 = vmatpush3.bf16.msra.mxu0 %v796_v6 }
  0x2a   : > { %738 = vmatprep.subr.bf16.mxu0 %v857_v2 }
  0x2d   : > { %739 = vmatpush3.bf16.msra.mxu0 %v797_v7 }
  0x2e   : > { %740 = vmatprep.subr.bf16.mxu0 %v857_v2 }
  0x31   : > { %741 = vmatpush3.bf16.msra.mxu0 %v798_v8 }
  0x32   : > { %742 = vmatprep.subr.bf16.mxu0 %v857_v2 }
  0x35   : > { %743 = vmatpush3.bf16.msra.mxu0 %v799_v9 }
  0x38   : > { %745 = vmatmul.mubr.bf16.vlgmr.msra.gmra.mrb[0].mxu0 %v368_v10 }
 0x10b   : > { %v467_v12 = vpop.f32.mrb[0].mxu0 }
 0x10c   : > { %v473_v13 = vadd.f32 %v467_v12, %v367_v11  ;;  %v746_v14 = vpop.f32.mrb[1].mxu0 }
 0x10d   : > { %v470_v15 = vpop.f32.mrb[2].mxu0 }
 0x10e   : > { %475 = vst.msk [vmem:[#allocation2] sm:$0x3] %vm474_vm2, %v473_v13  ;;  %v747_v16 = vpop.f32.mrb[3].mxu0 }
 0x10f PF: > { %477 = sbr.rel (!%p356_p4) target bundleno = 283 (0x11b), region = 52  ;;  %v703_v18 = vld [vmem:[%s1006_s2] ss:$0 sm:$0xff] (%p356_p4)  ;;  %vm488_vm3 = vcmask (%p356_p4), 254976  }
 0x115   : > { %v478_v17 = vld [vmem:[#allocation2] sm:$0x3] (%p356_p4) }
 0x116   : > { %v486_v19 = vadd.f32 %v703_v18, %v478_v17 }
 0x118   : > { %v487_v20 = vmax.f32 %v486_v19, 0.0 }
 0x11a   : > { %489 = vst.msk [vmem:[#allocation2] sm:$0x3] %vm488_vm3, %v487_v20 }
 0x11b PF: > { %p704_p6 = scmp.ne.s32.totalorder %s846_s21, 1 }
 0x11c   : > { %v800_v21 = vld [vmem:[%s1007_s3] sm:$0xff] (!%p704_p6)   ;;  %v859_v22 = vmov (!%p704_p6), 0.0   ;;  %v801_v23 = vld [vmem:[%s1007_s3 + $0x8] sm:$0xff] (!%p704_p6)   ;;  %vm860_vm4 = vmmov (!%p704_p6), 0   ;;  %vm519_vm5 = vcmask (!%p704_p6), 261120  }
 0x11d   : > { %493 = sbr.rel (%p704_p6) target bundleno = 510 (0x1fe), region = 56  ;;  %748 = vmatprep.subr.bf16.mxu0 (!%p704_p6), %v859_v22  ;;  %752 = vmatprep.mubr.msk.bf16.mxu0 (!%p704_p6), %vm860_vm4, %v859_v22  ;;  %v705_v26 = vld [vmem:[%s1008_s4] ss:$0 sm:$0xff] (!%p704_p6) }
 0x11e   : > { %749 = vmatpush3.bf16.msra.mxu0 (!%p704_p6), %v800_v21 }
 0x11f   : > { %750 = vmatprep.subr.bf16.mxu0 (!%p704_p6), %v859_v22 }
 0x121   : > { %v494_v24 = vld [vmem:[#allocation2] sm:$0x3] (!%p704_p6) }
 0x122   : > { %v495_v25 = vpack.c.bf16 (!%p704_p6), %v494_v24, %v494_v24  ;;  %751 = vmatpush3.bf16.msra.mxu0 (!%p704_p6), %v801_v23 }
 0x125   : > { %753 = vmatmul.mubr.msk.bf16.vlgmr.msra.gmra.mrb[0].mxu0 %vm519_vm5, %v495_v25 }
 0x1f8   : > { %v557_v27 = vpop.f32.mrb[0].mxu0 }
 0x1f9   : > { %v558_v28 = vadd.f32 %v705_v26, %v557_v27  ;;  %v754_v29 = vpop.f32.mrb[1].mxu0 }
 0x1fa   : > { %v560_v30 = vpop.f32.mrb[2].mxu0 }
 0x1fb   : > { %v563_v31 = vmax.f32 %v558_v28, 0.0  ;;  %v755_v32 = vpop.f32.mrb[3].mxu0 }
 0x1fd   : > { %564 = vst [vmem:[%s1010_s6] sm:$0x3] %v563_v31 }
 0x1fe PF: > { %p969_p7 = scmp.eq.s32.totalorder %s684_s24, 1  ;;  %s861_s11 = smov [#allocation2]  }
 0x1ff   : > { %s577_s12 = sshll.u32 %s861_s11, 4  ;;  %s578_s12 = int_to_ptr.vmem [resolvable:$true] %s577_s12 }
 0x200   : > { %s802_s13 = scalar_lea.vmem %s578_s12, 32  ;;  %p809_p11 = scmp.lt.s32.totalorder %s578_s12, %s578_s12 }
 0x201   : > { %p803_p8 = scmp.ne.s32.totalorder %s578_s12, %s802_s13  ;;  %p810_p12 = scmp.lt.s32.totalorder %s802_s13, %s802_s13 }
 0x203   : > { %p804_p9 = pnand %p803_p8, %p969_p7  ;;  %p811_p13 = por %p810_p12, %p809_p11 }
 0x205   : > { %p805_p10 = pneg %p804_p9 }
 0x207   : > { %p812_p0 = pnand %p811_p13, %p805_p10 }
 0x209   : > { %815 = shalt.err (!%p812_p0)
}
 0x20a   : > { %s816_s24 = scalar_lea.hbm %s1009_s5, 32 }
 0x20b   : > { %p817_p1 = scmp.ne.s32.totalorder %s1009_s5, %s816_s24  ;;  %p822_p4 = scmp.lt.u32.totalorder %s816_s24, %s1009_s5 }
 0x20d   : > { %p818_p2 = pnand %p817_p1, %p969_p7 }
 0x20f   : > { %p819_p3 = pneg %p818_p2 }
 0x211   : > { %p824_p5 = pnand %p822_p4, %p819_p3 }
 0x213   : > { %827 = shalt.err (!%p824_p5)
}
 0x214   : > { %757 = dma.vmem_to_hbm [thread:$0]  (%p969_p7), %s578_s12, 32, %s1009_s5, [#allocation3]  }
 0x215   : > { %841 = dma.done.wait (%p969_p7), [#allocation3], 32  }
 0x216   : > { %843 = vsyncadd (%p969_p7), [#allocation3], 4294967264 }
 0x217 PF: > { %s18_s23 = sadd.s32 1, %s854_s23   ;;  %s1012_s21 = smov %s850_s22 }
 0x218   : > { %p15_p6 = scmp.ge.s32.totalorder %s18_s23, 4   ;;  %s1013_s22 = smov %s1015_s25 }
 0x21a   :  { %17 = sbr.rel (!%p15_p6) target bundleno = 2 (0x2), region = 104 }
 0x221   :  { %602 = vsyncpa [#allocation3], 1 }
 0x222   :  { %604 = vsyncpa [#allocation3 + $0x1], 1 }

// kernel: autoencoder_forward.14
= control target key start
LH: loop header
LB: loop body
LE: loop exit
PB: predicated region body
PF: predicated region fallthrough
CT: control target
= control target key end

     0   :  { %vm53_vm0 = vcmask 261120   ;;  %vm130_vm1 = vcmask 130048   ;;  %s234_s1 = inlined_call_operand.vmem [shape: bf16[32,16], index: 1, kind: input, shape index: {}]   ;;  %s235_s0 = inlined_call_operand.vmem [shape: bf16[56,32], index: 0, kind: input, shape index: {}]   ;;  %s236_s2 = inlined_call_operand.vmem [shape: f32[56,16], index: 2, kind: output, shape index: {}]  }
   0x1   :  { %v174_v0 = vld [vmem:[%s234_s1] sm:$0xff]   ;;  %v175_v1 = vld [vmem:[%s234_s1 + $0x8] sm:$0xff]   ;;  %v177_v3 = vld [vmem:[%s235_s0 + $0x10] sm:$0xff]  }
   0x2   :  { %158 = vmatprep.subr.bf16.mxu0 %v174_v0  ;;  %170 = vmatprep.subr.bf16.mxu1 %v174_v0  ;;  %v176_v2 = vld [vmem:[%s235_s0] sm:$0xff]   ;;  %v178_v4 = vld [vmem:[%s235_s0 + $0x8] sm:$0xff]   ;;  %v179_v5 = vld [vmem:[%s235_s0 + $0x18] ss:$0 sps:$4 sm:$0xff]  }
   0x3   :  { %159 = vmatpush3.bf16.msra.mxu0 %v174_v0  ;;  %172 = vmatpush3.bf16.msra.mxu1 %v174_v0 }
   0x4   :  { %160 = vmatprep.subr.bf16.mxu0 %v175_v1  ;;  %171 = vmatprep.subr.bf16.mxu1 %v175_v1 }
   0x5   :  { %162 = vmatprep.mubr.msk.bf16.mxu0 %vm53_vm0, %v176_v2  ;;  %166 = vmatprep.mubr.msk.bf16.mxu1 %vm53_vm0, %v177_v3 }
   0x7   :  { %161 = vmatpush3.bf16.msra.mxu0 %v175_v1  ;;  %173 = vmatpush3.bf16.msra.mxu1 %v175_v1 }
   0xa   :  { %163 = vmatmul.mubr.msk.bf16.vlgmr.msra.gmra.mrb[0].mxu0 %vm53_vm0, %v178_v4  ;;  %167 = vmatmul.mubr.msk.bf16.vlgmr.msra.gmra.mrb[0].mxu1 %vm53_vm0, %v179_v5 }
  0xdd   :  { %v164_v6 = vpop.f32.mrb[0].mxu0  ;;  %v168_v7 = vpop.f32.mrb[0].mxu1 }
  0xde   :  { %133 = vst.msk [vmem:[%s236_s2 + $0x10] sm:$0xff] %vm130_vm1, %v164_v6  ;;  %137 = vst.msk [vmem:[%s236_s2 + $0x30] sm:$0xff] %vm130_vm1, %v168_v7  ;;  %v100_v8 = vpop.f32.mrb[1].mxu0  ;;  %v116_v9 = vpop.f32.mrb[1].mxu1 }
  0xdf   :  { %131 = vst.msk [vmem:[%s236_s2] sm:$0xff] %vm130_vm1, %v100_v8  ;;  %135 = vst.msk [vmem:[%s236_s2 + $0x20] sm:$0xff] %vm130_vm1, %v116_v9  ;;  %v165_v10 = vpop.f32.mrb[2].mxu0  ;;  %v169_v11 = vpop.f32.mrb[2].mxu1 }
  0xe0   :  { %134 = vst.msk [vmem:[%s236_s2 + $0x18] sm:$0xff] %vm130_vm1, %v165_v10  ;;  %v103_v12 = vpop.f32.mrb[3].mxu0  ;;  %v119_v13 = vpop.f32.mrb[3].mxu1 }
  0xe1   :  { %132 = vst.msk [vmem:[%s236_s2 + $0x8] sm:$0xff] %vm130_vm1, %v103_v12  ;;  %136 = vst.msk [vmem:[%s236_s2 + $0x28] sm:$0xff] %vm130_vm1, %v119_v13 }

// kernel: autoencoder_forward.15
= control target key start
LH: loop header
LB: loop body
LE: loop exit
PB: predicated region body
PF: predicated region fallthrough
CT: control target
= control target key end

     0   :  { %vm12_vm0 = vcmask 25600   ;;  %vm35_vm1 = vcmask 31744   ;;  %v162_v0 = vmov 0.0   ;;  %vm152_vm2 = vcmask 1040384   ;;  %s289_s0 = inlined_call_operand.vmem [shape: f32[168,4], index: 0, kind: input, shape index: {}]   ;;  %s290_s1 = inlined_call_operand.vmem [shape: f32[2,4], index: 1, kind: output, shape index: {}]  }
   0x1   :  { %13 = vst.msk [vmem:[%s290_s1] sm:$0x3] %vm12_vm0, %v162_v0  ;;  %v14_v1 = vld [vmem:[%s289_s0] sm:$0xff]  ;;  %v15_v2 = vld [vmem:[%s289_s0 + $0x8] sm:$0xff]  ;;  %v16_v3 = vld [vmem:[%s289_s0 + $0x10] sm:$0xff] }
   0x2   :  { %v36_v4 = vsel %vm35_vm1, %v14_v1, 0.0  ;;  %v37_v5 = vsel %vm35_vm1, %v15_v2, 0.0  ;;  %v39_v6 = vsel %vm35_vm1, %v16_v3, 0.0  ;;  %v17_v7 = vld [vmem:[%s289_s0 + $0x18] sm:$0xff]  ;;  %v18_v10 = vld [vmem:[%s289_s0 + $0x20] sm:$0xff]  ;;  %v19_v13 = vld [vmem:[%s289_s0 + $0x28] sm:$0xff]  ;;  %v83_v19 = vmul.f32 %v14_v1, %v14_v1 }
   0x3   :  { %v38_v8 = vadd.f32 %v37_v5, %v36_v4  ;;  %v41_v9 = vsel %vm35_vm1, %v17_v7, 0.0  ;;  %v43_v12 = vsel %vm35_vm1, %v18_v10, 0.0  ;;  %v45_v15 = vsel %vm35_vm1, %v19_v13, 0.0  ;;  %v20_v16 = vld [vmem:[%s289_s0 + $0x30] sm:$0xff]  ;;  %v21_v22 = vld [vmem:[%s289_s0 + $0x38] sm:$0xff]  ;;  %v22_v24 = vld [vmem:[%s289_s0 + $0x40] sm:$0xff] }
   0x4   :  { %v47_v18 = vsel %vm35_vm1, %v20_v16, 0.0  ;;  %v84_v20 = vmul.f32 %v15_v2, %v15_v2  ;;  %v85_v21 = vmul.f32 %v16_v3, %v16_v3  ;;  %v49_v25 = vsel %vm35_vm1, %v21_v22, 0.0  ;;  %v23_v33 = vld [vmem:[%s289_s0 + $0x48] sm:$0xff]  ;;  %v24_v39 = vld [vmem:[%s289_s0 + $0x50] sm:$0xff]  ;;  %v25_v45 = vld [vmem:[%s289_s0 + $0x58] sm:$0xff] }
   0x5   :  { %v40_v11 = vadd.f32 %v39_v6, %v38_v8  ;;  %v86_v26 = vmul.f32 %v17_v7, %v17_v7  ;;  %v51_v28 = vsel %vm35_vm1, %v22_v24, 0.0  ;;  %v87_v29 = vmul.f32 %v18_v10, %v18_v10  ;;  %v26_v51 = vld [vmem:[%s289_s0 + $0x60] sm:$0xff]  ;;  %v27_v57 = vld [vmem:[%s289_s0 + $0x68] sm:$0xff]  ;;  %v28_v63 = vld [vmem:[%s289_s0 + $0x70] sm:$0xff] }
   0x6   :  { %v104_v30 = vsel %vm35_vm1, %v83_v19, 0.0  ;;  %v105_v31 = vsel %vm35_vm1, %v84_v20, 0.0  ;;  %v107_v32 = vsel %vm35_vm1, %v85_v21, 0.0  ;;  %v53_v36 = vsel %vm35_vm1, %v23_v33, 0.0  ;;  %v29_v5 = vld [vmem:[%s289_s0 + $0x78] sm:$0xff] }
   0x7   :  { %v42_v14 = vadd.f32 %v41_v9, %v40_v11  ;;  %v106_v35 = vadd.f32 %v105_v31, %v104_v30  ;;  %v88_v37 = vmul.f32 %v19_v13, %v19_v13  ;;  %v109_v38 = vsel %vm35_vm1, %v86_v26, 0.0  ;;  %v30_v11 = vld [vmem:[%s289_s0 + $0x80] sm:$0xff] }
   0x8   :  { %v55_v42 = vsel %vm35_vm1, %v24_v39, 0.0  ;;  %v89_v43 = vmul.f32 %v20_v16, %v20_v16  ;;  %v111_v44 = vsel %vm35_vm1, %v87_v29, 0.0  ;;  %v57_v48 = vsel %vm35_vm1, %v25_v45, 0.0  ;;  %v33_v29 = vld [vmem:[%s289_s0 + $0x98] sm:$0xff] }
   0x9   :  { %v44_v17 = vadd.f32 %v43_v12, %v42_v14  ;;  %v108_v41 = vadd.f32 %v107_v32, %v106_v35  ;;  %v90_v49 = vmul.f32 %v21_v22, %v21_v22  ;;  %v113_v50 = vsel %vm35_vm1, %v88_v37, 0.0  ;;  %v34_v35 = vld [vmem:[%s289_s0 + $0xa0] sm:$0xff] }
   0xa   :  { %v59_v54 = vsel %vm35_vm1, %v26_v51, 0.0  ;;  %v91_v55 = vmul.f32 %v22_v24, %v22_v24  ;;  %v115_v56 = vsel %vm35_vm1, %v89_v43, 0.0  ;;  %v61_v60 = vsel %vm35_vm1, %v27_v57, 0.0 }
   0xb   :  { %v46_v23 = vadd.f32 %v45_v15, %v44_v17  ;;  %v110_v47 = vadd.f32 %v109_v38, %v108_v41  ;;  %v92_v61 = vmul.f32 %v23_v33, %v23_v33  ;;  %v117_v62 = vsel %vm35_vm1, %v90_v49, 0.0  ;;  %v31_v17 = vld [vmem:[%s289_s0 + $0x88] sm:$0xff] }
   0xc   :  { %v63_v2 = vsel %vm35_vm1, %v28_v63, 0.0  ;;  %v93_v3 = vmul.f32 %v24_v39, %v24_v39  ;;  %v119_v4 = vsel %vm35_vm1, %v91_v55, 0.0  ;;  %v65_v8 = vsel %vm35_vm1, %v29_v5, 0.0 }
   0xd   :  { %v48_v27 = vadd.f32 %v47_v18, %v46_v23  ;;  %v112_v53 = vadd.f32 %v111_v44, %v110_v47  ;;  %v94_v9 = vmul.f32 %v25_v45, %v25_v45  ;;  %v121_v10 = vsel %vm35_vm1, %v92_v61, 0.0  ;;  %v32_v23 = vld [vmem:[%s289_s0 + $0x90] sm:$0xff] }
   0xe   :  { %v67_v14 = vsel %vm35_vm1, %v30_v11, 0.0  ;;  %v95_v15 = vmul.f32 %v26_v51, %v26_v51  ;;  %v123_v16 = vsel %vm35_vm1, %v93_v3, 0.0  ;;  %v69_v20 = vsel %vm35_vm1, %v31_v17, 0.0 }
   0xf   :  { %v50_v34 = vadd.f32 %v49_v25, %v48_v27  ;;  %v114_v59 = vadd.f32 %v113_v50, %v112_v53  ;;  %v96_v21 = vmul.f32 %v27_v57, %v27_v57  ;;  %v125_v22 = vsel %vm35_vm1, %v94_v9, 0.0  ;;  %v151_v9 = vld [vmem:[%s290_s1] sm:$0x3] }
  0x10   :  { %v71_v26 = vsel %vm35_vm1, %v32_v23, 0.0  ;;  %v97_v27 = vmul.f32 %v28_v63, %v28_v63  ;;  %v73_v32 = vsel %vm35_vm1, %v33_v29, 0.0  ;;  %v98_v33 = vmul.f32 %v29_v5, %v29_v5 }
  0x11   :  { %v52_v40 = vadd.f32 %v51_v28, %v50_v34  ;;  %v116_v1 = vadd.f32 %v115_v56, %v114_v59  ;;  %v127_v28 = vsel %vm35_vm1, %v95_v15, 0.0  ;;  %v129_v34 = vsel %vm35_vm1, %v96_v21, 0.0 }
  0x12   :  { %v75_v38 = vsel %vm35_vm1, %v34_v35, 0.0  ;;  %v99_v39 = vmul.f32 %v30_v11, %v30_v11  ;;  %v100_v43 = vmul.f32 %v31_v17, %v31_v17  ;;  %v133_v44 = vsel %vm35_vm1, %v98_v33, 0.0 }
  0x13   :  { %v54_v46 = vadd.f32 %v53_v36, %v52_v40  ;;  %v118_v7 = vadd.f32 %v117_v62, %v116_v1  ;;  %v131_v40 = vsel %vm35_vm1, %v97_v27, 0.0  ;;  %v101_v47 = vmul.f32 %v32_v23, %v32_v23 }
  0x14   :  { %v102_v51 = vmul.f32 %v33_v29, %v33_v29 }
  0x15   :  { %v56_v52 = vadd.f32 %v55_v42, %v54_v46  ;;  %v120_v13 = vadd.f32 %v119_v4, %v118_v7  ;;  %v139_v55 = vsel %vm35_vm1, %v101_v47, 0.0 }
  0x17   :  { %v58_v58 = vadd.f32 %v57_v48, %v56_v52  ;;  %v122_v19 = vadd.f32 %v121_v10, %v120_v13  ;;  %v135_v48 = vsel %vm35_vm1, %v99_v39, 0.0  ;;  %v137_v52 = vsel %vm35_vm1, %v100_v43, 0.0 }
  0x19   :  { %v60_v0 = vadd.f32 %v59_v54, %v58_v58  ;;  %v124_v25 = vadd.f32 %v123_v16, %v122_v19  ;;  %v103_v54 = vmul.f32 %v34_v35, %v34_v35  ;;  %v141_v58 = vsel %vm35_vm1, %v102_v51, 0.0 }
  0x1b   :  { %v62_v6 = vadd.f32 %v61_v60, %v60_v0  ;;  %v126_v31 = vadd.f32 %v125_v22, %v124_v25  ;;  %v143_v60 = vsel %vm35_vm1, %v103_v54, 0.0 }
  0x1d   :  { %v64_v12 = vadd.f32 %v63_v2, %v62_v6  ;;  %v128_v37 = vadd.f32 %v127_v28, %v126_v31 }
  0x1f   :  { %v66_v18 = vadd.f32 %v65_v8, %v64_v12  ;;  %v130_v42 = vadd.f32 %v129_v34, %v128_v37 }
  0x21   :  { %v68_v24 = vadd.f32 %v67_v14, %v66_v18  ;;  %v132_v46 = vadd.f32 %v131_v40, %v130_v42 }
  0x23   :  { %v70_v30 = vadd.f32 %v69_v20, %v68_v24  ;;  %v134_v50 = vadd.f32 %v133_v44, %v132_v46 }
  0x25   :  { %v72_v36 = vadd.f32 %v71_v26, %v70_v30  ;;  %v136_v53 = vadd.f32 %v135_v48, %v134_v50 }
  0x27   :  { %v74_v41 = vadd.f32 %v73_v32, %v72_v36  ;;  %v138_v57 = vadd.f32 %v137_v52, %v136_v53 }
  0x29   :  { %v76_v45 = vadd.f32 %v75_v38, %v74_v41  ;;  %v140_v59 = vadd.f32 %v139_v55, %v138_v57 }
  0x2b   :  { %v77_v49 = vrot.slane %v76_v45, 4  ;;  %v142_v62 = vadd.f32 %v141_v58, %v140_v59 }
  0x2d   :  { %v78_v56 = vadd.f32 %v77_v49, %v76_v45  ;;  %v144_v63 = vadd.f32 %v143_v60, %v142_v62 }
  0x2f   :  { %v79_v61 = vrot.slane %v78_v56, 2  ;;  %v145_v1 = vrot.slane %v144_v63, 4 }
  0x31   :  { %v80_v0 = vadd.f32 %v79_v61, %v78_v56  ;;  %v146_v2 = vadd.f32 %v145_v1, %v144_v63 }
  0x33   :  { %v81_v3 = vrot.slane %v80_v0, 1  ;;  %v147_v4 = vrot.slane %v146_v2, 2 }
  0x35   :  { %v148_v5 = vadd.f32 %v147_v4, %v146_v2  ;;  %v82_v6 = vadd.f32 %v81_v3, %v80_v0 }
  0x37   :  { %v149_v7 = vrot.slane %v148_v5, 1 }
  0x39   :  { %v150_v8 = vadd.f32 %v149_v7, %v148_v5 }
  0x3b   :  { %v153_v10 = vsel %vm152_vm2, %v82_v6, %v150_v8 }
  0x3c   :  { %v154_v11 = vadd.f32 %v153_v10, %v151_v9 }
  0x3e   :  { %156 = vst.msk [vmem:[%s290_s1] sm:$0x3] %vm12_vm0, %v154_v11 }

// kernel: tile.68
= control target key start
LH: loop header
LB: loop body
LE: loop exit
PB: predicated region body
PF: predicated region fallthrough
CT: control target
= control target key end

     0   :  { %s22_s0 = inlined_call_operand.vmem [shape: f32[3], index: 0, kind: input, shape index: {}]   ;;  %s23_s1 = inlined_call_operand.vmem [shape: f32[4,3], index: 1, kind: output, shape index: {}]  }
   0x1   :  { %v4_v0 = vld [vmem:[%s22_s0] ss:$0 sm:$0xff] }
   0x2   :  { %5 = vst [vmem:[%s23_s1] sm:$0xf] %v4_v0 }

// kernel: tile.69
= control target key start
LH: loop header
LB: loop body
LE: loop exit
PB: predicated region body
PF: predicated region fallthrough
CT: control target
= control target key end

     0   :  { %vm7_vm0 = vcmask 23552   ;;  %s37_s8 = smov 3   ;;  %s38_s9 = smov 6   ;;  %vm13_vm1 = vcmask 97352   ;;  %vm19_vm2 = vcmask 72752   ;;  %vm25_vm3 = vcmask 48152   ;;  %s55_s0 = inlined_call_operand.vmem [shape: f32[4,3], index: 0, kind: input, shape index: {}]   ;;  %s56_s1 = inlined_call_operand.vmem [shape: f32[1,12], index: 1, kind: output, shape index: {}]  }
   0x1   :  { %v4_v0 = vld [vmem:[%s55_s0] sm:$0xf]  ;;  %s36_s0 = smov 9  }
   0x2   :  { %5 = vst [vmem:[#allocation1] sm:$0xf] %v4_v0 }
   0x9   :  { %v10_v1 = vld [vmem:[#allocation1 + $0x3] sm:$0x1]   ;;  %v22_v2 = vld [vmem:[#allocation1 + $0x1] sm:$0x1]   ;;  %v6_v3 = vld [vmem:[#allocation1] sm:$0x1]  }
   0xa   :  { %11 = vrot.lane.b32.xlu0 %v10_v1, %s36_s0  ;;  %23 = vrot.lane.b32.xlu1 %v22_v2, %s37_s8  ;;  %v16_v4 = vld [vmem:[#allocation1 + $0x2] sm:$0x1]   ;;  %8 = vst.msk [vmem:[#allocation0] sm:$0x1] %vm7_vm0, %v6_v3  }
   0xe   :  { %17 = vrot.lane.b32.xlu0 %v16_v4, %s38_s9 }
  0x7c   :  { %v12_v5 = vpop.permute.xlu0 %11   ;;  %v24_v6 = vpop.permute.xlu1 %23  }
  0x7d   :  { %14 = vst.msk [vmem:[#allocation0] sm:$0x1] %vm13_vm1, %v12_v5  }
  0x80   :  { %v18_v7 = vpop.permute.xlu0 %17  }
  0x81   :  { %20 = vst.msk [vmem:[#allocation0] sm:$0x1] %vm19_vm2, %v18_v7  }
  0x82   :  { %26 = vst.msk [vmem:[#allocation0] sm:$0x1] %vm25_vm3, %v24_v6  }
  0x89   :  { %v30_v8 = vld [vmem:[#allocation0] sm:$0x1] }
  0x8a   :  { %32 = vst [vmem:[%s56_s1] sm:$0x1] %v30_v8 }

// kernel: autoencoder_forward.17
= control target key start
LH: loop header
LB: loop body
LE: loop exit
PB: predicated region body
PF: predicated region fallthrough
CT: control target
= control target key end

     0   :  { %v463_v0 = vmov 0.0   ;;  %vm464_vm0 = vmmov 0   ;;  %vm118_vm1 = vcmask 130048   ;;  %vm319_vm2 = vcmask 97280   ;;  %s683_s1 = inlined_call_operand.vmem [shape: bf16[16,12], index: 1, kind: input, shape index: {}]   ;;  %s684_s0 = inlined_call_operand.vmem [shape: bf16[200,16], index: 0, kind: input, shape index: {}]   ;;  %s685_s2 = inlined_call_operand.vmem [shape: f32[1,12], index: 2, kind: input, shape index: {}]   ;;  %s686_s3 = inlined_call_operand.vmem [shape: f32[200,12], index: 3, kind: output, shape index: {}]  }
   0x1   :  { %391 = vmatprep.subr.bf16.mxu0 %v463_v0  ;;  %v449_v1 = vld [vmem:[%s683_s1] sm:$0xff]   ;;  %393 = vmatprep.mubr.msk.bf16.mxu0 %vm464_vm0, %v463_v0  ;;  %v451_v3 = vld [vmem:[%s684_s0 + $0x38] sm:$0xff]   ;;  %v452_v4 = vld [vmem:[%s684_s0 + $0x8] sm:$0xff]  }
   0x2   :  { %v450_v2 = vld [vmem:[%s684_s0] sm:$0xff]   ;;  %445 = vmatprep.subr.bf16.mxu1 %v463_v0  ;;  %421 = vmatprep.mubr.msk.bf16.mxu1 %vm464_vm0, %v463_v0  ;;  %v454_v6 = vld [vmem:[%s684_s0 + $0x10] sm:$0xff]   ;;  %v455_v7 = vld [vmem:[%s684_s0 + $0x48] sm:$0xff]  }
   0x3   :  { %392 = vmatpush3.bf16.msra.mxu0 %v449_v1  ;;  %446 = vmatpush3.bf16.msra.mxu1 %v449_v1  ;;  %v453_v5 = vld [vmem:[%s684_s0 + $0x40] sm:$0xff]   ;;  %v456_v8 = vld [vmem:[%s684_s0 + $0x18] sm:$0xff]   ;;  %v457_v9 = vld [vmem:[%s684_s0 + $0x50] sm:$0xff]  }
   0x4   :  { %v458_v10 = vld [vmem:[%s684_s0 + $0x20] sm:$0xff]   ;;  %v459_v11 = vld [vmem:[%s684_s0 + $0x58] sm:$0xff]   ;;  %v460_v12 = vld [vmem:[%s684_s0 + $0x28] sm:$0xff]  }
   0x5   :  { %v461_v13 = vld [vmem:[%s684_s0 + $0x60] ss:$0 sps:$4 sm:$0xff]   ;;  %v462_v14 = vld [vmem:[%s684_s0 + $0x30] sm:$0xff]  }
   0x6   :  { %394 = vmatmul.mubr.msk.bf16.vlgmr.msra.gmra.mrb[0].mxu0 %vm118_vm1, %v450_v2  ;;  %422 = vmatmul.mubr.msk.bf16.vlgmr.msra.gmra.mrb[0].mxu1 %vm118_vm1, %v451_v3  ;;  %v556_v15 = vld [vmem:[%s685_s2] ss:$0 sm:$0xff] }
   0x7   :  { %397 = vmatprep.mubr.msk.bf16.mxu0 %vm464_vm0, %v463_v0  ;;  %425 = vmatprep.mubr.msk.bf16.mxu1 %vm464_vm0, %v463_v0 }
   0xe   :  { %398 = vmatmul.mubr.msk.bf16.gmra.mrb[4].mxu0 %vm118_vm1, %v452_v4  ;;  %426 = vmatmul.mubr.msk.bf16.gmra.mrb[4].mxu1 %vm118_vm1, %v453_v5 }
   0xf   :  { %401 = vmatprep.mubr.msk.bf16.mxu0 %vm464_vm0, %v463_v0  ;;  %429 = vmatprep.mubr.msk.bf16.mxu1 %vm464_vm0, %v463_v0 }
  0x16   :  { %402 = vmatmul.mubr.msk.bf16.gmra.mrb[8].mxu0 %vm118_vm1, %v454_v6  ;;  %430 = vmatmul.mubr.msk.bf16.gmra.mrb[8].mxu1 %vm118_vm1, %v455_v7 }
  0x17   :  { %405 = vmatprep.mubr.msk.bf16.mxu0 %vm464_vm0, %v463_v0  ;;  %433 = vmatprep.mubr.msk.bf16.mxu1 %vm464_vm0, %v463_v0 }
  0x1e   :  { %406 = vmatmul.mubr.msk.bf16.gmra.mrb[12].mxu0 %vm118_vm1, %v456_v8  ;;  %434 = vmatmul.mubr.msk.bf16.gmra.mrb[12].mxu1 %vm118_vm1, %v457_v9 }
  0x1f   :  { %409 = vmatprep.mubr.msk.bf16.mxu0 %vm464_vm0, %v463_v0  ;;  %437 = vmatprep.mubr.msk.bf16.mxu1 %vm464_vm0, %v463_v0 }
  0x26   :  { %410 = vmatmul.mubr.msk.bf16.gmra.mrb[16].mxu0 %vm118_vm1, %v458_v10  ;;  %438 = vmatmul.mubr.msk.bf16.gmra.mrb[16].mxu1 %vm118_vm1, %v459_v11 }
  0x27   :  { %413 = vmatprep.mubr.msk.bf16.mxu0 %vm464_vm0, %v463_v0  ;;  %441 = vmatprep.mubr.msk.bf16.mxu1 %vm464_vm0, %v463_v0 }
  0x2e   :  { %414 = vmatmul.mubr.msk.bf16.gmra.mrb[20].mxu0 %vm118_vm1, %v460_v12  ;;  %442 = vmatmul.mubr.msk.bf16.gmra.mrb[20].mxu1 %vm118_vm1, %v461_v13 }
  0x2f   :  { %417 = vmatprep.mubr.msk.bf16.mxu0 %vm464_vm0, %v463_v0 }
  0x36   :  { %418 = vmatmul.mubr.msk.bf16.gmra.mrb[24].mxu0 %vm118_vm1, %v462_v14 }
  0xd9   :  { %v192_v16 = vpop.f32.mrb[0].mxu0  ;;  %v248_v17 = vpop.f32.mrb[0].mxu1 }
  0xda   :  { %v193_v18 = vadd.f32 %v556_v15, %v192_v16  ;;  %v395_v19 = vpop.f32.mrb[1].mxu0  ;;  %v249_v20 = vadd.f32 %v556_v15, %v248_v17  ;;  %v423_v21 = vpop.f32.mrb[1].mxu1 }
  0xdb   :  { %v195_v22 = vpop.f32.mrb[2].mxu0  ;;  %v251_v23 = vpop.f32.mrb[2].mxu1 }
  0xdc   :  { %v294_v24 = vmax.f32 %v193_v18, 0.0  ;;  %v196_v25 = vadd.f32 %v556_v15, %v195_v22  ;;  %v396_v26 = vpop.f32.mrb[3].mxu0  ;;  %v308_v27 = vmax.f32 %v249_v20, 0.0  ;;  %v252_v28 = vadd.f32 %v556_v15, %v251_v23  ;;  %v424_v29 = vpop.f32.mrb[3].mxu1 }
  0xde   :  { %320 = vst.msk [vmem:[%s686_s3] sm:$0xff] %vm319_vm2, %v294_v24  ;;  %v295_v30 = vmax.f32 %v196_v25, 0.0  ;;  %334 = vst.msk [vmem:[%s686_s3 + $0x70] sm:$0xff] %vm319_vm2, %v308_v27  ;;  %v309_v31 = vmax.f32 %v252_v28, 0.0 }
  0xe0   :  { %321 = vst.msk [vmem:[%s686_s3 + $0x8] sm:$0xff] %vm319_vm2, %v295_v30  ;;  %335 = vst.msk [vmem:[%s686_s3 + $0x78] sm:$0xff] %vm319_vm2, %v309_v31 }
  0xe1   :  { %v200_v32 = vpop.f32.mrb[4].mxu0  ;;  %v256_v33 = vpop.f32.mrb[4].mxu1 }
  0xe2   :  { %v201_v34 = vadd.f32 %v556_v15, %v200_v32  ;;  %v399_v35 = vpop.f32.mrb[5].mxu0  ;;  %v257_v36 = vadd.f32 %v556_v15, %v256_v33  ;;  %v427_v37 = vpop.f32.mrb[5].mxu1 }
  0xe3   :  { %v203_v38 = vpop.f32.mrb[6].mxu0  ;;  %v259_v39 = vpop.f32.mrb[6].mxu1 }
  0xe4   :  { %v296_v40 = vmax.f32 %v201_v34, 0.0  ;;  %v204_v41 = vadd.f32 %v556_v15, %v203_v38  ;;  %v400_v42 = vpop.f32.mrb[7].mxu0  ;;  %v310_v43 = vmax.f32 %v257_v36, 0.0  ;;  %v260_v44 = vadd.f32 %v556_v15, %v259_v39  ;;  %v428_v45 = vpop.f32.mrb[7].mxu1 }
  0xe6   :  { %322 = vst.msk [vmem:[%s686_s3 + $0x10] sm:$0xff] %vm319_vm2, %v296_v40  ;;  %v297_v46 = vmax.f32 %v204_v41, 0.0  ;;  %336 = vst.msk [vmem:[%s686_s3 + $0x80] sm:$0xff] %vm319_vm2, %v310_v43  ;;  %v311_v47 = vmax.f32 %v260_v44, 0.0 }
  0xe8   :  { %323 = vst.msk [vmem:[%s686_s3 + $0x18] sm:$0xff] %vm319_vm2, %v297_v46  ;;  %337 = vst.msk [vmem:[%s686_s3 + $0x88] sm:$0xff] %vm319_vm2, %v311_v47 }
  0xe9   :  { %v208_v48 = vpop.f32.mrb[8].mxu0  ;;  %v264_v49 = vpop.f32.mrb[8].mxu1 }
  0xea   :  { %v209_v50 = vadd.f32 %v556_v15, %v208_v48  ;;  %v403_v51 = vpop.f32.mrb[9].mxu0  ;;  %v265_v52 = vadd.f32 %v556_v15, %v264_v49  ;;  %v431_v53 = vpop.f32.mrb[9].mxu1 }
  0xeb   :  { %v211_v54 = vpop.f32.mrb[10].mxu0  ;;  %v267_v55 = vpop.f32.mrb[10].mxu1 }
  0xec   :  { %v298_v56 = vmax.f32 %v209_v50, 0.0  ;;  %v212_v57 = vadd.f32 %v556_v15, %v211_v54  ;;  %v404_v58 = vpop.f32.mrb[11].mxu0  ;;  %v312_v59 = vmax.f32 %v265_v52, 0.0  ;;  %v268_v60 = vadd.f32 %v556_v15, %v267_v55  ;;  %v432_v61 = vpop.f32.mrb[11].mxu1 }
  0xee   :  { %324 = vst.msk [vmem:[%s686_s3 + $0x20] sm:$0xff] %vm319_vm2, %v298_v56  ;;  %v299_v62 = vmax.f32 %v212_v57, 0.0  ;;  %338 = vst.msk [vmem:[%s686_s3 + $0x90] sm:$0xff] %vm319_vm2, %v312_v59  ;;  %v313_v63 = vmax.f32 %v268_v60, 0.0 }
  0xf0   :  { %325 = vst.msk [vmem:[%s686_s3 + $0x28] sm:$0xff] %vm319_vm2, %v299_v62  ;;  %339 = vst.msk [vmem:[%s686_s3 + $0x98] sm:$0xff] %vm319_vm2, %v313_v63 }
  0xf1   :  { %v216_v0 = vpop.f32.mrb[12].mxu0  ;;  %v272_v1 = vpop.f32.mrb[12].mxu1 }
  0xf2   :  { %v217_v2 = vadd.f32 %v556_v15, %v216_v0  ;;  %v407_v3 = vpop.f32.mrb[13].mxu0  ;;  %v273_v4 = vadd.f32 %v556_v15, %v272_v1  ;;  %v435_v5 = vpop.f32.mrb[13].mxu1 }
  0xf3   :  { %v219_v6 = vpop.f32.mrb[14].mxu0  ;;  %v275_v7 = vpop.f32.mrb[14].mxu1 }
  0xf4   :  { %v300_v8 = vmax.f32 %v217_v2, 0.0  ;;  %v220_v9 = vadd.f32 %v556_v15, %v219_v6  ;;  %v408_v10 = vpop.f32.mrb[15].mxu0  ;;  %v314_v11 = vmax.f32 %v273_v4, 0.0  ;;  %v276_v12 = vadd.f32 %v556_v15, %v275_v7  ;;  %v436_v13 = vpop.f32.mrb[15].mxu1 }
  0xf6   :  { %326 = vst.msk [vmem:[%s686_s3 + $0x30] sm:$0xff] %vm319_vm2, %v300_v8  ;;  %v301_v14 = vmax.f32 %v220_v9, 0.0  ;;  %340 = vst.msk [vmem:[%s686_s3 + $0xa0] sm:$0xff] %vm319_vm2, %v314_v11  ;;  %v315_v16 = vmax.f32 %v276_v12, 0.0 }
  0xf8   :  { %327 = vst.msk [vmem:[%s686_s3 + $0x38] sm:$0xff] %vm319_vm2, %v301_v14  ;;  %341 = vst.msk [vmem:[%s686_s3 + $0xa8] sm:$0xff] %vm319_vm2, %v315_v16 }
  0xf9   :  { %v224_v17 = vpop.f32.mrb[16].mxu0  ;;  %v280_v18 = vpop.f32.mrb[16].mxu1 }
  0xfa   :  { %v225_v19 = vadd.f32 %v556_v15, %v224_v17  ;;  %v411_v20 = vpop.f32.mrb[17].mxu0  ;;  %v281_v21 = vadd.f32 %v556_v15, %v280_v18  ;;  %v439_v22 = vpop.f32.mrb[17].mxu1 }
  0xfb   :  { %v227_v23 = vpop.f32.mrb[18].mxu0  ;;  %v283_v24 = vpop.f32.mrb[18].mxu1 }
  0xfc   :  { %v302_v25 = vmax.f32 %v225_v19, 0.0  ;;  %v228_v26 = vadd.f32 %v556_v15, %v227_v23  ;;  %v412_v27 = vpop.f32.mrb[19].mxu0  ;;  %v316_v28 = vmax.f32 %v281_v21, 0.0  ;;  %v284_v29 = vadd.f32 %v556_v15, %v283_v24  ;;  %v440_v30 = vpop.f32.mrb[19].mxu1 }
  0xfe   :  { %328 = vst.msk [vmem:[%s686_s3 + $0x40] sm:$0xff] %vm319_vm2, %v302_v25  ;;  %v303_v31 = vmax.f32 %v228_v26, 0.0  ;;  %342 = vst.msk [vmem:[%s686_s3 + $0xb0] sm:$0xff] %vm319_vm2, %v316_v28  ;;  %v317_v32 = vmax.f32 %v284_v29, 0.0 }
 0x100   :  { %329 = vst.msk [vmem:[%s686_s3 + $0x48] sm:$0xff] %vm319_vm2, %v303_v31  ;;  %343 = vst.msk [vmem:[%s686_s3 + $0xb8] sm:$0xff] %vm319_vm2, %v317_v32 }
 0x101   :  { %v232_v33 = vpop.f32.mrb[20].mxu0  ;;  %v288_v34 = vpop.f32.mrb[20].mxu1 }
 0x102   :  { %v233_v35 = vadd.f32 %v556_v15, %v232_v33  ;;  %v415_v36 = vpop.f32.mrb[21].mxu0  ;;  %v289_v37 = vadd.f32 %v556_v15, %v288_v34  ;;  %v443_v38 = vpop.f32.mrb[21].mxu1 }
 0x103   :  { %v235_v39 = vpop.f32.mrb[22].mxu0  ;;  %v291_v40 = vpop.f32.mrb[22].mxu1 }
 0x104   :  { %v304_v41 = vmax.f32 %v233_v35, 0.0  ;;  %v236_v42 = vadd.f32 %v556_v15, %v235_v39  ;;  %v416_v43 = vpop.f32.mrb[23].mxu0  ;;  %v318_v44 = vmax.f32 %v289_v37, 0.0  ;;  %v444_v45 = vpop.f32.mrb[23].mxu1 }
 0x106   :  { %330 = vst.msk [vmem:[%s686_s3 + $0x50] sm:$0xff] %vm319_vm2, %v304_v41  ;;  %v305_v46 = vmax.f32 %v236_v42, 0.0  ;;  %344 = vst.msk [vmem:[%s686_s3 + $0xc0] sm:$0xff] %vm319_vm2, %v318_v44 }
 0x108   :  { %331 = vst.msk [vmem:[%s686_s3 + $0x58] sm:$0xff] %vm319_vm2, %v305_v46 }
 0x109   :  { %v240_v47 = vpop.f32.mrb[24].mxu0 }
 0x10a   :  { %v241_v48 = vadd.f32 %v556_v15, %v240_v47  ;;  %v419_v49 = vpop.f32.mrb[25].mxu0 }
 0x10b   :  { %v243_v50 = vpop.f32.mrb[26].mxu0 }
 0x10c   :  { %v306_v51 = vmax.f32 %v241_v48, 0.0  ;;  %v244_v52 = vadd.f32 %v556_v15, %v243_v50  ;;  %v420_v53 = vpop.f32.mrb[27].mxu0 }
 0x10e   :  { %332 = vst.msk [vmem:[%s686_s3 + $0x60] sm:$0xff] %vm319_vm2, %v306_v51  ;;  %v307_v54 = vmax.f32 %v244_v52, 0.0 }
 0x110   :  { %333 = vst.msk [vmem:[%s686_s3 + $0x68] sm:$0xff] %vm319_vm2, %v307_v54 }

</bundles_post_ra>
